<compile_context>
chip_gen: v5e
topology: v5e:2x2
jax: 0.10.0
libtpu: 0.0.40
codegen_flags: <defaults>
</compile_context>

<pallas_src>
import jax
import jax.numpy as jnp
from jax.experimental import pallas as pl
from jax.experimental.pallas import tpu as pltpu


def relu_conv1x1_kernel(x_ref, w_ref, o_ref, xbf_ref):
    # Hoisted: ReLU (VPU) + bf16 cast of the resident activation block, done
    # exactly once (grid axis is "arbitrary" => step 0 runs first).
    @pl.when(pl.program_id(0) == 0)
    def _():
        xbf_ref[...] = jnp.maximum(x_ref[...], 0.0).astype(jnp.bfloat16)

    # Weight arrives f32 from HBM; cast to bf16 in-kernel (cheaper than a
    # separate wrapper-side cast op doing an extra HBM roundtrip).
    w = w_ref[...].astype(jnp.bfloat16)
    o_ref[...] = jnp.dot(
        w, xbf_ref[...], preferred_element_type=jnp.float32
    ).astype(o_ref.dtype)


def relu_conv1x1(x_nchw, weight_oihw, *, tile_cout=512):
    """x_nchw: (1, C_in, H, W) f32; weight_oihw: (C_out, C_in, 1, 1) f32."""
    N, C_in, H, W = x_nchw.shape
    C_out = weight_oihw.shape[0]
    assert N == 1, "kernel assumes batch 1 (free NCHW<->2D reshape)"
    assert C_out % tile_cout == 0

    M = N * H * W
    # Free reshapes: no transposes, no HBM copies, no dtype casts here.
    x2d = x_nchw.reshape(C_in, M)             # (C_in, M),  f32
    w2d = weight_oihw.reshape(C_out, C_in)    # (C_out, C_in), f32

    grid = (C_out // tile_cout,)

    cost = pl.CostEstimate(
        flops=2 * M * C_in * C_out,
        transcendentals=0,
        bytes_accessed=x2d.size * 4 + w2d.size * 4 + C_out * M * 4,
    )

    out2d = pl.pallas_call(
        relu_conv1x1_kernel,
        out_shape=jax.ShapeDtypeStruct((C_out, M), jnp.float32),
        grid=grid,
        in_specs=[
            # Activations: single block, resident across all grid steps.
            pl.BlockSpec((C_in, M), lambda i: (0, 0)),
            # Weights: tiled over C_out -> double-buffered by the pipeline.
            pl.BlockSpec((tile_cout, C_in), lambda i: (i, 0)),
        ],
        out_specs=pl.BlockSpec((tile_cout, M), lambda i: (i, 0)),
        scratch_shapes=[
            # bf16 cache of relu(x), persists across grid steps.
            pltpu.VMEM((C_in, M), jnp.bfloat16),
        ],
        compiler_params=pltpu.CompilerParams(
            # Sequential: guarantees the step-0 scratch init precedes later
            # steps (scratch is per-core, so this axis must not be sharded).
            dimension_semantics=("arbitrary",),
        ),
        cost_estimate=cost,
    )(x2d, w2d)

    # (C_out, M) -> (N, C_out, H, W): free reshape, no transpose.
    return out2d.reshape(N, C_out, H, W)


if __name__ == "__main__":
    key = jax.random.PRNGKey(0)
    kx, kw = jax.random.split(key)

    # Shapes from the module: x285 ~ (1, 256, 14, 14),
    # conv2d87 weight ~ (1024, 256, 1, 1), bias=False.
    x = jax.random.normal(kx, (1, 256, 14, 14), dtype=jnp.float32)
    w = jax.random.normal(kw, (1024, 256, 1, 1), dtype=jnp.float32) * 0.05

    out = relu_conv1x1(x, w)
    out = jax.block_until_ready(out)

    # Plain-JAX f32 reference (same math as the PyTorch module).
    ref = jnp.einsum(
        "nchw,oc->nohw", jnp.maximum(x, 0.0), w.reshape(1024, 256)
    )
    assert out.shape == (1, 1024, 14, 14), out.shape
    # Tolerance accounts for bf16 MXU inputs with f32 accumulation (K=256).
    assert jnp.allclose(out, ref, atol=2e-2, rtol=2e-2), float(
        jnp.max(jnp.abs(out - ref))
    )

    print("KERNEL_OK")
</pallas_src>

<mosaic_0001>
module attributes {stable_mosaic.version = 11 : i64} {
  func.func @relu_conv1x1_kernel(%arg0: i32, %arg1: memref<256x196xf32, #tpu.memory_space<vmem>>, %arg2: memref<512x256xf32, #tpu.memory_space<vmem>>, %arg3: memref<512x196xf32, #tpu.memory_space<vmem>>, %arg4: memref<256x196xbf16, #tpu.memory_space<vmem>>) attributes {dimension_semantics = [#tpu.dimension_semantics<arbitrary>], iteration_bounds = array<i64: 2>, scalar_prefetch = 0 : i64, scratch_operands = 1 : i64, tpu.core_type = #tpu.core_type<tc>, window_params = [{pipeline_mode = #tpu.pipeline_mode<synchronous>, transform_indices = @transform_0, window_bounds = array<i64: 256, 196>}, {transform_indices = @transform_1, window_bounds = array<i64: 512, 256>}, {transform_indices = @transform_2, window_bounds = array<i64: 512, 196>}]} {
    %c0_i32 = arith.constant 0 : i32
    %0 = arith.cmpi eq, %arg0, %c0_i32 : i32
    %1 = arith.extui %0 : i1 to i32
    %c0_i32_0 = arith.constant 0 : i32
    %2 = arith.cmpi ne, %1, %c0_i32_0 : i32
    scf.if %2 {
      %c0_6 = arith.constant 0 : index
      %c0_7 = arith.constant 0 : index
      %8 = vector.load %arg1[%c0_6, %c0_7] : memref<256x196xf32, #tpu.memory_space<vmem>>, vector<256x196xf32>
      %cst_8 = arith.constant 0.000000e+00 : f32
      %9 = vector.broadcast %cst_8 : f32 to vector<256x196xf32>
      %10 = arith.maximumf %8, %9 : vector<256x196xf32>
      %11 = arith.truncf %10 : vector<256x196xf32> to vector<256x196xbf16>
      %c0_9 = arith.constant 0 : index
      %c0_10 = arith.constant 0 : index
      %12 = vector.load %arg4[%c0_9, %c0_10] : memref<256x196xbf16, #tpu.memory_space<vmem>>, vector<256x196xbf16>
      tpu.vector_store %arg4[%c0_9, %c0_10], %11 {strides = array<i32>} : memref<256x196xbf16, #tpu.memory_space<vmem>>, vector<256x196xbf16>,
    } else {
    }
    %c0 = arith.constant 0 : index
    %c0_1 = arith.constant 0 : index
    %3 = vector.load %arg2[%c0, %c0_1] : memref<512x256xf32, #tpu.memory_space<vmem>>, vector<512x256xf32>
    %4 = arith.truncf %3 : vector<512x256xf32> to vector<512x256xbf16>
    %c0_2 = arith.constant 0 : index
    %c0_3 = arith.constant 0 : index
    %5 = vector.load %arg4[%c0_2, %c0_3] : memref<256x196xbf16, #tpu.memory_space<vmem>>, vector<256x196xbf16>
    %cst = arith.constant dense<0.000000e+00> : vector<512x196xf32>
    %6 = tpu.matmul %4, %5, %cst {dimension_numbers = #tpu.dot_dimension_numbers<[1], [0], [0], [1], [0, 0, 1, 1], [], []>} : vector<512x256xbf16>, vector<256x196xbf16>, vector<512x196xf32> -> vector<512x196xf32>
    %c0_4 = arith.constant 0 : index
    %c0_5 = arith.constant 0 : index
    %7 = vector.load %arg3[%c0_4, %c0_5] : memref<512x196xf32, #tpu.memory_space<vmem>>, vector<512x196xf32>
    tpu.vector_store %arg3[%c0_4, %c0_5], %6 {strides = array<i32>} : memref<512x196xf32, #tpu.memory_space<vmem>>, vector<512x196xf32>,
    return
  }
  func.func @transform_0(%arg0: i32) -> (i32, i32) {
    %c0_i32 = arith.constant 0 : i32
    %c0_i32_0 = arith.constant 0 : i32
    %c0_i32_1 = arith.constant 0 : i32
    return %c0_i32, %c0_i32_0 : i32, i32
  }
  func.func @transform_1(%arg0: i32) -> (i32, i32) {
    %c0_i32 = arith.constant 0 : i32
    %c0_i32_0 = arith.constant 0 : i32
    return %arg0, %c0_i32 : i32, i32
  }
  func.func @transform_2(%arg0: i32) -> (i32, i32) {
    %c0_i32 = arith.constant 0 : i32
    %c0_i32_0 = arith.constant 0 : i32
    return %arg0, %c0_i32 : i32, i32
  }
}

</mosaic_0001>

<bundles_post_ra>
// kernel: tpu_custom_call.1
= control target key start
LH: loop header
LB: loop body
LE: loop exit
PB: predicated region body
PF: predicated region fallthrough
CT: control target
= control target key end

     0   :  { %7 = vsyncpa [#allocation4], 0  ;;  %s2607_s0 = inlined_call_operand.vmem [shape: f32[256,196], index: 0, kind: input, shape index: {}]   ;;  %s2608_s1 = inlined_call_operand.hbm [shape: f32[1024,256], index: 1, kind: input, shape index: {}]   ;;  %s2609_s2 = inlined_call_operand.vmem [shape: f32[1024,196], index: 2, kind: output, shape index: {}]  }
   0x1   :  { %9 = vsyncpa [#allocation4 + $0x1], 0  ;;  %s1931_s9 = smov 0   ;;  %s1933_s10 = smov 0  }
   0x2   :  { %s1935_s11 = smov 0   ;;  %s1937_s12 = smov 0  }
   0x3 LB: > { %s1950_s13 = sadd.s32 4294967295, %s1912_s12   ;;  %s1953_s14 = sadd.s32 1, %s1912_s12   ;;  %s1912_s12 = sphi %s1937_s12, %s2618_s12   ;;  %s1908_s11 = sphi %s1935_s11, %s2617_s11   ;;  %s1904_s10 = sphi %s1933_s10, %s2616_s10   ;;  %s1900_s9 = sphi %s1931_s9, %s2615_s9  }
   0x4   : > { %s40_s15 = ssub.s32 %s1912_s12, %s1953_s14  ;;  %s43_s16 = sadd.s32 1, %s1908_s11 }
   0x5   : > { %p41_p0 = scmp.eq.s32.totalorder %s40_s15, 0  ;;  %p50_p1 = scmp.ne.s32.totalorder %s1908_s11, %s1904_s10 }
   0x6   : > { %p51_p2 = scmp.eq.s32.totalorder %s1912_s12, 0  ;;  %p56_p3 = scmp.ne.s32.totalorder %s1904_s10, %s1900_s9 }
   0x7   : > { %s1963_s17 = scalar_select %p41_p0, %s1908_s11, %s43_s16  }
   0x8   : > { %p1965_p4 = por %p51_p2, %p50_p1  ;;  %p57_p5 = scmp.eq.s32.totalorder %s1950_s13, 0 }
   0x9   : > { %p1813_p6 = scmp.lt.s32.totalorder %s1912_s12, 2  ;;  %s109_s20 = sand.u32 1, %s1908_s11  }
   0xa   : > { %p1971_p7 = por %p57_p5, %p56_p3  ;;  %s1632_s21 = sshll.u32 %s109_s20, 10 }
   0xb   : > { %s1773_s22 = sshll.u32 %s1912_s12, 10  ;;  %s113_s26 = scalar_lea.vmem [#allocation3], %s1632_s21 }
   0xc   : > { %s119_s25 = scalar_lea.hbm %s2608_s1, %s1773_s22  ;;  %s122_s27 = sshll.u32 %s113_s26, 4  ;;  %s123_s27 = int_to_ptr.vmem [resolvable:$true] %s122_s27 }
   0xd   : > { %s120_s28 = sshll.u32 %s119_s25, 4  ;;  %p1982_p8 = pnand %p1813_p6, %p1965_p4  ;;  %s121_s28 = int_to_ptr.hbm [resolvable:$true] %s120_s28 }
   0xe   : > { %p1636_p9 = scmp.ge.s32.totalorder %s1912_s12, 1  ;;  %s110_s30 = scalar_lea.sflag [#allocation4], %s109_s20 }
   0xf   : > { %s1848_s3 = sshra.s32 %s121_s28, 4  ;;  %p1852_p11 = pneg %p1982_p8  ;;  %s1849_s3 = int_to_ptr.hbm [resolvable:$true] %s1848_s3 }
  0x10   : > { %s1850_s4 = scalar_lea.hbm %s1849_s3, 1024  ;;  %s1855_s7 = scalar_lea.hbm %s2608_s1, 2048 }
  0x11   : > { %p1851_p10 = scmp.ne.s32.totalorder %s1849_s3, %s1850_s4  ;;  %p1856_p0 = scmp.lt.s32.totalorder %s1849_s3, %s2608_s1 }
  0x12   : > { %p1857_p1 = scmp.lt.s32.totalorder %s1855_s7, %s1850_s4 }
  0x13   : > { %p1853_p12 = pnand %p1852_p11, %p1851_p10 }
  0x14   : > { %p1858_p2 = por %p1857_p1, %p1856_p0 }
  0x15   : > { %p1854_p13 = pneg %p1853_p12 }
  0x17   : > { %p1859_p3 = pnand %p1858_p2, %p1854_p13 }
  0x19   : > { %1862 = shalt.err (!%p1859_p3)
}
  0x1a   : > { %s1914_s15 = smov 256   ;;  %s1915_s16 = smov 16  }
  0x1b   : > { %1812 = dma.hbm_to_vmem [thread:$0]  (!%p1982_p8), %s121_s28, 16384, %s123_s27, %s110_s30, %s1914_s15, %s1914_s15, %s1915_s16  }
  0x1c   : > { %p130_p4 = scmp.lt.s32.totalorder %s1912_s12, 3 }
  0x1e   : > { %p131_p5 = pnand %p1636_p9, %p130_p4 }
  0x1f   : > { %s136_s18 = sand.u32 (!%p131_p5), 1, %s1904_s10  }
  0x20   : > { %134 = sbr.rel (%p131_p5) target bundleno = 761 (0x2f9), region = 28  ;;  %s1637_s20 = sshll.u32 (!%p131_p5), %s136_s18, 10 }
  0x21   : > { %s137_s21 = scalar_lea.sflag (!%p131_p5), [#allocation4], %s136_s18  ;;  %s2001_s22 = scalar_lea.vmem (!%p131_p5), [#allocation3], %s1637_s20 }
  0x25   : > { %1895 = dma.done.wait (%p1971_p7), %s137_s21, 16384  }
  0x26   : > { %1897 = vsyncadd (%p1971_p7), %s137_s21, 4294950912  ;;  %s1638_s23 = sshll.u32 %s1950_s13, 6  ;;  %p1641_p8 = scmp.ne.s32.totalorder %s1950_s13, 0 }
  0x27   : > { %p165_p6 = scmp.lt.s32.totalorder %s1638_s23, 127 }
  0x28   : > { %174 = sbr.rel (%p1641_p8) target bundleno = 82 (0x52), region = 36 }
  0x29   : > { %s2620_s23 = smov (!%p165_p6, %s1638_s23), 127 }
  0x2a   : > { %s1774_s24 = sshll.u32 %s2620_s23, 4 }
  0x2b   : > { %s2011_s26 = scalar_lea.vmem %s2609_s2, %s1774_s24 }
  0x2d   : > { %v175_v0 = vld [vmem:[%s2607_s0] sm:$0xff]  ;;  %v176_v1 = vld [vmem:[%s2607_s0 + $0x8] sm:$0xff]  ;;  %vm335_vm0 = vcmask 1043456   ;;  %vm336_vm1 = vcmask 556036   ;;  %v177_v2 = vld [vmem:[%s2607_s0 + $0x10] sm:$0xff] }
  0x2e   : > { %v239_v3 = vmax.f32 %v175_v0, 0.0  ;;  %v240_v4 = vmax.f32 %v176_v1, 0.0  ;;  %vm2023_vm2 = vmor %vm336_vm1, %vm335_vm0  ;;  %v178_v6 = vld [vmem:[%s2607_s0 + $0x18] sm:$0xff]  ;;  %v241_v7 = vmax.f32 %v177_v2, 0.0  ;;  %v179_v8 = vld [vmem:[%s2607_s0 + $0x20] sm:$0xff] }
  0x2f   : > { %v242_v9 = vmax.f32 %v178_v6, 0.0  ;;  %v180_v10 = vld [vmem:[%s2607_s0 + $0x28] sm:$0xff]  ;;  %v243_v11 = vmax.f32 %v179_v8, 0.0  ;;  %v181_v12 = vld [vmem:[%s2607_s0 + $0x30] sm:$0xff]  ;;  %v182_v13 = vld [vmem:[%s2607_s0 + $0x38] sm:$0xff] }
  0x30   : > { %v303_v14 = vpack.c.bf16 %v240_v4, %v239_v3  ;;  %v244_v15 = vmax.f32 %v180_v10, 0.0  ;;  %v245_v16 = vmax.f32 %v181_v12, 0.0  ;;  %v246_v17 = vmax.f32 %v182_v13, 0.0  ;;  %v183_v18 = vld [vmem:[%s2607_s0 + $0x40] sm:$0xff]  ;;  %v184_v19 = vld [vmem:[%s2607_s0 + $0x48] sm:$0xff]  ;;  %v185_v20 = vld [vmem:[%s2607_s0 + $0x50] sm:$0xff] }
  0x31   : > { %v304_v21 = vpack.c.bf16 %v242_v9, %v241_v7  ;;  %v247_v22 = vmax.f32 %v183_v18, 0.0  ;;  %v248_v23 = vmax.f32 %v184_v19, 0.0  ;;  %v186_v24 = vld [vmem:[%s2607_s0 + $0x58] sm:$0xff]  ;;  %v249_v25 = vmax.f32 %v185_v20, 0.0  ;;  %v187_v26 = vld [vmem:[%s2607_s0 + $0x60] sm:$0xff]  ;;  %v188_v27 = vld [vmem:[%s2607_s0 + $0x68] sm:$0xff] }
  0x32   : > { %338 = vst.msk [vmem:[#allocation2] sm:$0xff] %vm2023_vm2, %v303_v14  ;;  %v305_v28 = vpack.c.bf16 %v244_v15, %v243_v11  ;;  %v306_v29 = vpack.c.bf16 %v246_v17, %v245_v16  ;;  %v250_v30 = vmax.f32 %v186_v24, 0.0  ;;  %v251_v31 = vmax.f32 %v187_v26, 0.0  ;;  %v189_v32 = vld [vmem:[%s2607_s0 + $0x70] sm:$0xff]  ;;  %v190_v33 = vld [vmem:[%s2607_s0 + $0x78] sm:$0xff]  ;;  %v191_v34 = vld [vmem:[%s2607_s0 + $0x80] sm:$0xff] }
  0x33   : > { %339 = vst.msk [vmem:[#allocation2 + $0x8] sm:$0xff] %vm2023_vm2, %v304_v21  ;;  %v307_v35 = vpack.c.bf16 %v248_v23, %v247_v22  ;;  %v252_v36 = vmax.f32 %v188_v27, 0.0  ;;  %v253_v37 = vmax.f32 %v189_v32, 0.0  ;;  %v254_v38 = vmax.f32 %v190_v33, 0.0  ;;  %v192_v39 = vld [vmem:[%s2607_s0 + $0x88] sm:$0xff]  ;;  %v193_v40 = vld [vmem:[%s2607_s0 + $0x90] sm:$0xff] }
  0x34   : > { %340 = vst.msk [vmem:[#allocation2 + $0x10] sm:$0xff] %vm2023_vm2, %v305_v28  ;;  %v308_v41 = vpack.c.bf16 %v250_v30, %v249_v25  ;;  %v255_v42 = vmax.f32 %v191_v34, 0.0  ;;  %v256_v43 = vmax.f32 %v192_v39, 0.0  ;;  %v194_v44 = vld [vmem:[%s2607_s0 + $0x98] sm:$0xff]  ;;  %v257_v45 = vmax.f32 %v193_v40, 0.0  ;;  %v195_v46 = vld [vmem:[%s2607_s0 + $0xa0] sm:$0xff] }
  0x35   : > { %341 = vst.msk [vmem:[#allocation2 + $0x18] sm:$0xff] %vm2023_vm2, %v306_v29  ;;  %v309_v47 = vpack.c.bf16 %v252_v36, %v251_v31  ;;  %v310_v48 = vpack.c.bf16 %v254_v38, %v253_v37  ;;  %v258_v49 = vmax.f32 %v194_v44, 0.0  ;;  %v196_v50 = vld [vmem:[%s2607_s0 + $0xa8] sm:$0xff]  ;;  %v259_v51 = vmax.f32 %v195_v46, 0.0  ;;  %v197_v52 = vld [vmem:[%s2607_s0 + $0xb0] sm:$0xff]  ;;  %v198_v53 = vld [vmem:[%s2607_s0 + $0xb8] sm:$0xff] }
  0x36   : > { %342 = vst.msk [vmem:[#allocation2 + $0x20] sm:$0xff] %vm2023_vm2, %v307_v35  ;;  %v311_v54 = vpack.c.bf16 %v256_v43, %v255_v42  ;;  %v260_v55 = vmax.f32 %v196_v50, 0.0  ;;  %v261_v56 = vmax.f32 %v197_v52, 0.0  ;;  %v262_v57 = vmax.f32 %v198_v53, 0.0  ;;  %v199_v58 = vld [vmem:[%s2607_s0 + $0xc0] sm:$0xff]  ;;  %v200_v59 = vld [vmem:[%s2607_s0 + $0xc8] sm:$0xff] }
  0x37   : > { %343 = vst.msk [vmem:[#allocation2 + $0x28] sm:$0xff] %vm2023_vm2, %v308_v41  ;;  %v312_v60 = vpack.c.bf16 %v258_v49, %v257_v45  ;;  %v263_v61 = vmax.f32 %v199_v58, 0.0  ;;  %v264_v62 = vmax.f32 %v200_v59, 0.0  ;;  %v201_v63 = vld [vmem:[%s2607_s0 + $0xd0] sm:$0xff]  ;;  %v202_v0 = vld [vmem:[%s2607_s0 + $0xd8] sm:$0xff]  ;;  %v203_v1 = vld [vmem:[%s2607_s0 + $0xe0] sm:$0xff] }
  0x38   : > { %344 = vst.msk [vmem:[#allocation2 + $0x30] sm:$0xff] %vm2023_vm2, %v309_v47  ;;  %v313_v2 = vpack.c.bf16 %v260_v55, %v259_v51  ;;  %v265_v3 = vmax.f32 %v201_v63, 0.0  ;;  %v266_v4 = vmax.f32 %v202_v0, 0.0  ;;  %v204_v6 = vld [vmem:[%s2607_s0 + $0xe8] sm:$0xff]  ;;  %v205_v7 = vld [vmem:[%s2607_s0 + $0xf0] sm:$0xff]  ;;  %v206_v8 = vld [vmem:[%s2607_s0 + $0xf8] sm:$0xff]  ;;  %v314_v9 = vpack.c.bf16 %v262_v57, %v261_v56 }
  0x39   : > { %345 = vst.msk [vmem:[#allocation2 + $0x38] sm:$0xff] %vm2023_vm2, %v310_v48  ;;  %v267_v10 = vmax.f32 %v203_v1, 0.0  ;;  %v268_v11 = vmax.f32 %v204_v6, 0.0  ;;  %v269_v12 = vmax.f32 %v205_v7, 0.0  ;;  %v207_v13 = vld [vmem:[%s2607_s0 + $0x100] sm:$0xff]  ;;  %v208_v14 = vld [vmem:[%s2607_s0 + $0x108] sm:$0xff]  ;;  %v315_v15 = vpack.c.bf16 %v264_v62, %v263_v61 }
  0x3a   : > { %346 = vst.msk [vmem:[#allocation2 + $0x40] sm:$0xff] %vm2023_vm2, %v311_v54  ;;  %v270_v16 = vmax.f32 %v206_v8, 0.0  ;;  %v271_v17 = vmax.f32 %v207_v13, 0.0  ;;  %v272_v18 = vmax.f32 %v208_v14, 0.0  ;;  %v209_v19 = vld [vmem:[%s2607_s0 + $0x110] sm:$0xff]  ;;  %v210_v20 = vld [vmem:[%s2607_s0 + $0x118] sm:$0xff]  ;;  %v316_v21 = vpack.c.bf16 %v266_v4, %v265_v3 }
  0x3b   : > { %347 = vst.msk [vmem:[#allocation2 + $0x48] sm:$0xff] %vm2023_vm2, %v312_v60  ;;  %v273_v22 = vmax.f32 %v209_v19, 0.0  ;;  %v274_v23 = vmax.f32 %v210_v20, 0.0  ;;  %v211_v24 = vld [vmem:[%s2607_s0 + $0x120] sm:$0xff]  ;;  %v212_v25 = vld [vmem:[%s2607_s0 + $0x128] sm:$0xff]  ;;  %v213_v26 = vld [vmem:[%s2607_s0 + $0x130] sm:$0xff]  ;;  %v317_v27 = vpack.c.bf16 %v268_v11, %v267_v10 }
  0x3c   : > { %348 = vst.msk [vmem:[#allocation2 + $0x50] sm:$0xff] %vm2023_vm2, %v313_v2  ;;  %v275_v28 = vmax.f32 %v211_v24, 0.0  ;;  %v276_v29 = vmax.f32 %v212_v25, 0.0  ;;  %v214_v30 = vld [vmem:[%s2607_s0 + $0x138] sm:$0xff]  ;;  %v215_v31 = vld [vmem:[%s2607_s0 + $0x140] sm:$0xff]  ;;  %v216_v32 = vld [vmem:[%s2607_s0 + $0x148] sm:$0xff]  ;;  %v318_v33 = vpack.c.bf16 %v270_v16, %v269_v12  ;;  %v319_v38 = vpack.c.bf16 %v272_v18, %v271_v17 }
  0x3d   : > { %349 = vst.msk [vmem:[#allocation2 + $0x58] sm:$0xff] %vm2023_vm2, %v314_v9  ;;  %v277_v34 = vmax.f32 %v213_v26, 0.0  ;;  %v278_v35 = vmax.f32 %v214_v30, 0.0  ;;  %v217_v36 = vld [vmem:[%s2607_s0 + $0x150] sm:$0xff]  ;;  %v218_v37 = vld [vmem:[%s2607_s0 + $0x158] sm:$0xff]  ;;  %v279_v39 = vmax.f32 %v215_v31, 0.0  ;;  %v320_v43 = vpack.c.bf16 %v274_v23, %v273_v22 }
  0x3e   : > { %350 = vst.msk [vmem:[#allocation2 + $0x60] sm:$0xff] %vm2023_vm2, %v315_v15  ;;  %v280_v40 = vmax.f32 %v216_v32, 0.0  ;;  %v219_v41 = vld [vmem:[%s2607_s0 + $0x160] sm:$0xff]  ;;  %v220_v42 = vld [vmem:[%s2607_s0 + $0x168] sm:$0xff]  ;;  %v281_v44 = vmax.f32 %v217_v36, 0.0  ;;  %v282_v45 = vmax.f32 %v218_v37, 0.0  ;;  %v321_v49 = vpack.c.bf16 %v276_v29, %v275_v28 }
  0x3f   : > { %351 = vst.msk [vmem:[#allocation2 + $0x68] sm:$0xff] %vm2023_vm2, %v316_v21  ;;  %v221_v46 = vld [vmem:[%s2607_s0 + $0x170] sm:$0xff]  ;;  %v222_v47 = vld [vmem:[%s2607_s0 + $0x178] sm:$0xff]  ;;  %v223_v48 = vld [vmem:[%s2607_s0 + $0x180] sm:$0xff]  ;;  %v283_v50 = vmax.f32 %v219_v41, 0.0  ;;  %v284_v51 = vmax.f32 %v220_v42, 0.0  ;;  %v322_v55 = vpack.c.bf16 %v278_v35, %v277_v34 }
  0x40   : > { %352 = vst.msk [vmem:[#allocation2 + $0x70] sm:$0xff] %vm2023_vm2, %v317_v27  ;;  %v224_v52 = vld [vmem:[%s2607_s0 + $0x188] sm:$0xff]  ;;  %v225_v53 = vld [vmem:[%s2607_s0 + $0x190] sm:$0xff]  ;;  %v226_v54 = vld [vmem:[%s2607_s0 + $0x198] sm:$0xff]  ;;  %v285_v56 = vmax.f32 %v221_v46, 0.0  ;;  %v286_v57 = vmax.f32 %v222_v47, 0.0  ;;  %v323_v60 = vpack.c.bf16 %v280_v40, %v279_v39  ;;  %v324_v1 = vpack.c.bf16 %v282_v45, %v281_v44 }
  0x41   : > { %353 = vst.msk [vmem:[#allocation2 + $0x78] sm:$0xff] %vm2023_vm2, %v318_v33  ;;  %v227_v58 = vld [vmem:[%s2607_s0 + $0x1a0] sm:$0xff]  ;;  %v228_v59 = vld [vmem:[%s2607_s0 + $0x1a8] sm:$0xff]  ;;  %v287_v61 = vmax.f32 %v223_v48, 0.0  ;;  %v288_v62 = vmax.f32 %v224_v52, 0.0  ;;  %v229_v63 = vld [vmem:[%s2607_s0 + $0x1b0] sm:$0xff]  ;;  %v325_v7 = vpack.c.bf16 %v284_v51, %v283_v50 }
  0x42   : > { %354 = vst.msk [vmem:[#allocation2 + $0x80] sm:$0xff] %vm2023_vm2, %v319_v38  ;;  %v230_v0 = vld [vmem:[%s2607_s0 + $0x1b8] sm:$0xff]  ;;  %v289_v2 = vmax.f32 %v225_v53, 0.0  ;;  %v290_v3 = vmax.f32 %v226_v54, 0.0  ;;  %v231_v4 = vld [vmem:[%s2607_s0 + $0x1c0] sm:$0xff]  ;;  %v232_v6 = vld [vmem:[%s2607_s0 + $0x1c8] sm:$0xff]  ;;  %v326_v12 = vpack.c.bf16 %v286_v57, %v285_v56 }
  0x43   : > { %355 = vst.msk [vmem:[#allocation2 + $0x88] sm:$0xff] %vm2023_vm2, %v320_v43  ;;  %v291_v8 = vmax.f32 %v227_v58, 0.0  ;;  %v292_v9 = vmax.f32 %v228_v59, 0.0  ;;  %v233_v10 = vld [vmem:[%s2607_s0 + $0x1d0] sm:$0xff]  ;;  %v234_v11 = vld [vmem:[%s2607_s0 + $0x1d8] sm:$0xff]  ;;  %v293_v13 = vmax.f32 %v229_v63, 0.0  ;;  %v327_v17 = vpack.c.bf16 %v288_v62, %v287_v61 }
  0x44   : > { %356 = vst.msk [vmem:[#allocation2 + $0x90] sm:$0xff] %vm2023_vm2, %v321_v49  ;;  %v294_v14 = vmax.f32 %v230_v0, 0.0  ;;  %v235_v15 = vld [vmem:[%s2607_s0 + $0x1e0] sm:$0xff]  ;;  %v236_v16 = vld [vmem:[%s2607_s0 + $0x1e8] sm:$0xff]  ;;  %v295_v18 = vmax.f32 %v231_v4, 0.0  ;;  %v296_v19 = vmax.f32 %v232_v6, 0.0  ;;  %v328_v22 = vpack.c.bf16 %v290_v3, %v289_v2 }
  0x45   : > { %357 = vst.msk [vmem:[#allocation2 + $0x98] sm:$0xff] %vm2023_vm2, %v322_v55  ;;  %v237_v20 = vld [vmem:[%s2607_s0 + $0x1f0] sm:$0xff]  ;;  %v238_v21 = vld [vmem:[%s2607_s0 + $0x1f8] sm:$0xff]  ;;  %v297_v23 = vmax.f32 %v233_v10, 0.0  ;;  %v298_v24 = vmax.f32 %v234_v11, 0.0  ;;  %v329_v25 = vpack.c.bf16 %v292_v9, %v291_v8  ;;  %v299_v26 = vmax.f32 %v235_v15, 0.0 }
  0x46   : > { %358 = vst.msk [vmem:[#allocation2 + $0xa0] sm:$0xff] %vm2023_vm2, %v323_v60  ;;  %v300_v27 = vmax.f32 %v236_v16, 0.0  ;;  %v330_v28 = vpack.c.bf16 %v294_v14, %v293_v13  ;;  %v301_v29 = vmax.f32 %v237_v20, 0.0  ;;  %v302_v30 = vmax.f32 %v238_v21, 0.0 }
  0x47   : > { %359 = vst.msk [vmem:[#allocation2 + $0xa8] sm:$0xff] %vm2023_vm2, %v324_v1  ;;  %v331_v31 = vpack.c.bf16 %v296_v19, %v295_v18  ;;  %v332_v32 = vpack.c.bf16 %v298_v24, %v297_v23 }
  0x48   : > { %360 = vst.msk [vmem:[#allocation2 + $0xb0] sm:$0xff] %vm2023_vm2, %v325_v7  ;;  %v333_v33 = vpack.c.bf16 %v300_v27, %v299_v26  ;;  %v334_v34 = vpack.c.bf16 %v302_v30, %v301_v29 }
  0x49   : > { %361 = vst.msk [vmem:[#allocation2 + $0xb8] sm:$0xff] %vm2023_vm2, %v326_v12 }
  0x4a   : > { %362 = vst.msk [vmem:[#allocation2 + $0xc0] sm:$0xff] %vm2023_vm2, %v327_v17 }
  0x4b   : > { %363 = vst.msk [vmem:[#allocation2 + $0xc8] sm:$0xff] %vm2023_vm2, %v328_v22 }
  0x4c   : > { %364 = vst.msk [vmem:[#allocation2 + $0xd0] sm:$0xff] %vm2023_vm2, %v329_v25 }
  0x4d   : > { %365 = vst.msk [vmem:[#allocation2 + $0xd8] sm:$0xff] %vm2023_vm2, %v330_v28 }
  0x4e   : > { %366 = vst.msk [vmem:[#allocation2 + $0xe0] sm:$0xff] %vm2023_vm2, %v331_v31 }
  0x4f   : > { %367 = vst.msk [vmem:[#allocation2 + $0xe8] sm:$0xff] %vm2023_vm2, %v332_v32 }
  0x50   : > { %368 = vst.msk [vmem:[#allocation2 + $0xf0] sm:$0xff] %vm2023_vm2, %v333_v33 }
  0x51   : > { %369 = vst.msk [vmem:[#allocation2 + $0xf8] sm:$0xff] %vm2023_vm2, %v334_v34 }
  0x52 PF: > { %v1700_v35 = vld [vmem:[#allocation2 + $0x70] sm:$0xf]  ;;  %v1790_v36 = vld [vmem:[#allocation2 + $0x74] sm:$0xf0]  ;;  %v1789_v40 = vld [vmem:[#allocation2 + $0x74] sm:$0xf] }
  0x53   : > { %v1701_v38 = vor.u32 %v1790_v36, %v1700_v35  ;;  %v1702_v41 = vld [vmem:[#allocation2 + $0x78] sm:$0xf0]  ;;  %v1692_v46 = vld [vmem:[#allocation2 + $0x60] sm:$0xf]  ;;  %v1788_v48 = vld [vmem:[#allocation2 + $0x64] sm:$0xf0] }
  0x54   : > { %v1705_v43 = vor.u32 %v1789_v40, %v1702_v41  ;;  %v1693_v5 = vor.u32 %v1788_v48, %v1692_v46  ;;  %v1787_v52 = vld [vmem:[#allocation2 + $0x64] sm:$0xf]  ;;  %v1694_v53 = vld [vmem:[#allocation2 + $0x68] sm:$0xf0]  ;;  %v1684_v57 = vld [vmem:[#allocation2 + $0x50] sm:$0xf] }
  0x55   : > { %754 = vmatpush.bf16.msra.mxu0 %v1701_v38  ;;  %v1756_v49 = vld [vmem:[#allocation2 + $0xe0] sm:$0xf]  ;;  %v1803_v54 = vld [vmem:[#allocation2 + $0xe4] sm:$0xf]  ;;  %v1697_v55 = vor.u32 %v1787_v52, %v1694_v53  ;;  %v1786_v58 = vld [vmem:[#allocation2 + $0x54] sm:$0xf0] }
  0x56   : > { %v1804_v50 = vld [vmem:[#allocation2 + $0xe4] sm:$0xf0]  ;;  %1092 = vmatpush.bf16.msra.mxu2 %v1705_v43  ;;  %v1758_v56 = vld [vmem:[#allocation2 + $0xe8] sm:$0xf0]  ;;  %v1748_v60 = vld [vmem:[#allocation2 + $0xd0] sm:$0xf]  ;;  %v1685_v63 = vor.u32 %v1786_v58, %v1684_v57 }
  0x57   : > { %v1764_v37 = vld [vmem:[#allocation2 + $0xf0] sm:$0xf]  ;;  %v1805_v44 = vld [vmem:[#allocation2 + $0xf4] sm:$0xf]  ;;  %v1757_v51 = vor.u32 %v1804_v50, %v1756_v49  ;;  %v1761_v59 = vor.u32 %v1803_v54, %v1758_v56  ;;  %v1802_v61 = vld [vmem:[#allocation2 + $0xd4] sm:$0xf0] }
  0x58   : > { %v1806_v39 = vld [vmem:[#allocation2 + $0xf4] sm:$0xf0]  ;;  %v1766_v45 = vld [vmem:[#allocation2 + $0xf8] sm:$0xf0]  ;;  %v1785_v62 = vld [vmem:[#allocation2 + $0x54] sm:$0xf]  ;;  %v1749_v3 = vor.u32 %v1802_v61, %v1748_v60 }
  0x59   : > { %v1765_v42 = vor.u32 %v1806_v39, %v1764_v37  ;;  %v1769_v47 = vor.u32 %v1805_v44, %v1766_v45  ;;  %755 = vmatpush.bf16.msra.mxu0 %v1693_v5  ;;  %v1686_v0 = vld [vmem:[#allocation2 + $0x58] sm:$0xf0]  ;;  %v1801_v1 = vld [vmem:[#allocation2 + $0xd4] sm:$0xf]  ;;  %v1676_v6 = vld [vmem:[#allocation2 + $0x40] sm:$0xf] }
  0x5a   : > { %v1750_v2 = vld [vmem:[#allocation2 + $0xd8] sm:$0xf0]  ;;  %1093 = vmatpush.bf16.msra.mxu2 %v1697_v55  ;;  %v1689_v4 = vor.u32 %v1785_v62, %v1686_v0  ;;  %v1784_v7 = vld [vmem:[#allocation2 + $0x44] sm:$0xf0]  ;;  %v1740_v8 = vld [vmem:[#allocation2 + $0xc0] sm:$0xf] }
  0x5b   : > { %923 = vmatpush.bf16.msra.mxu1 %v1765_v42  ;;  %1261 = vmatpush.bf16.msra.mxu3 %v1769_v47  ;;  %v1753_v9 = vor.u32 %v1801_v1, %v1750_v2  ;;  %v1800_v10 = vld [vmem:[#allocation2 + $0xc4] sm:$0xf0]  ;;  %v1783_v11 = vld [vmem:[#allocation2 + $0x44] sm:$0xf]  ;;  %v1678_v12 = vld [vmem:[#allocation2 + $0x48] sm:$0xf0]  ;;  %v1677_v15 = vor.u32 %v1784_v7, %v1676_v6 }
  0x5c   : > { %v1799_v13 = vld [vmem:[#allocation2 + $0xc4] sm:$0xf]  ;;  %v1742_v14 = vld [vmem:[#allocation2 + $0xc8] sm:$0xf0]  ;;  %v1741_v16 = vor.u32 %v1800_v10, %v1740_v8  ;;  %v1681_v17 = vor.u32 %v1783_v11, %v1678_v12  ;;  %v1668_v18 = vld [vmem:[#allocation2 + $0x30] sm:$0xf] }
  0x5d   : > { %756 = vmatpush.bf16.msra.mxu0 %v1685_v63  ;;  %v1782_v19 = vld [vmem:[#allocation2 + $0x34] sm:$0xf0]  ;;  %v1732_v20 = vld [vmem:[#allocation2 + $0xb0] sm:$0xf]  ;;  %v1745_v21 = vor.u32 %v1799_v13, %v1742_v14  ;;  %v1781_v23 = vld [vmem:[#allocation2 + $0x34] sm:$0xf] }
  0x5e   : > { %1094 = vmatpush.bf16.msra.mxu2 %v1689_v4  ;;  %v1798_v22 = vld [vmem:[#allocation2 + $0xb4] sm:$0xf0]  ;;  %v1670_v24 = vld [vmem:[#allocation2 + $0x38] sm:$0xf0]  ;;  %v1797_v25 = vld [vmem:[#allocation2 + $0xb4] sm:$0xf]  ;;  %v1669_v27 = vor.u32 %v1782_v19, %v1668_v18 }
  0x5f   : > { %924 = vmatpush.bf16.msra.mxu1 %v1757_v51  ;;  %1262 = vmatpush.bf16.msra.mxu3 %v1761_v59  ;;  %v1734_v26 = vld [vmem:[#allocation2 + $0xb8] sm:$0xf0]  ;;  %v1733_v28 = vor.u32 %v1798_v22, %v1732_v20  ;;  %v1673_v29 = vor.u32 %v1781_v23, %v1670_v24  ;;  %v1660_v30 = vld [vmem:[#allocation2 + $0x20] sm:$0xf]  ;;  %v1780_v31 = vld [vmem:[#allocation2 + $0x24] sm:$0xf0] }
  0x60   : > { %v1724_v32 = vld [vmem:[#allocation2 + $0xa0] sm:$0xf]  ;;  %v1737_v33 = vor.u32 %v1797_v25, %v1734_v26  ;;  %v1796_v34 = vld [vmem:[#allocation2 + $0xa4] sm:$0xf0]  ;;  %v1779_v35 = vld [vmem:[#allocation2 + $0x24] sm:$0xf]  ;;  %v1661_v39 = vor.u32 %v1780_v31, %v1660_v30 }
  0x61   : > { %757 = vmatpush.bf16.msra.mxu0 %v1677_v15  ;;  %v1662_v36 = vld [vmem:[#allocation2 + $0x28] sm:$0xf0]  ;;  %v1795_v37 = vld [vmem:[#allocation2 + $0xa4] sm:$0xf]  ;;  %v1725_v40 = vor.u32 %v1796_v34, %v1724_v32  ;;  %v1652_v42 = vld [vmem:[#allocation2 + $0x10] sm:$0xf] }
  0x62   : > { %1095 = vmatpush.bf16.msra.mxu2 %v1681_v17  ;;  %v1726_v38 = vld [vmem:[#allocation2 + $0xa8] sm:$0xf0]  ;;  %v1665_v41 = vor.u32 %v1779_v35, %v1662_v36  ;;  %v1778_v43 = vld [vmem:[#allocation2 + $0x14] sm:$0xf0]  ;;  %v1716_v44 = vld [vmem:[#allocation2 + $0x90] sm:$0xf] }
  0x63   : > { %925 = vmatpush.bf16.msra.mxu1 %v1749_v3  ;;  %1263 = vmatpush.bf16.msra.mxu3 %v1753_v9  ;;  %v1729_v45 = vor.u32 %v1795_v37, %v1726_v38  ;;  %v1794_v46 = vld [vmem:[#allocation2 + $0x94] sm:$0xf0]  ;;  %v1777_v47 = vld [vmem:[#allocation2 + $0x14] sm:$0xf]  ;;  %v1654_v48 = vld [vmem:[#allocation2 + $0x18] sm:$0xf0]  ;;  %v1653_v5 = vor.u32 %v1778_v43, %v1652_v42 }
  0x64   : > { %v1793_v49 = vld [vmem:[#allocation2 + $0x94] sm:$0xf]  ;;  %v1718_v50 = vld [vmem:[#allocation2 + $0x98] sm:$0xf0]  ;;  %v1717_v51 = vor.u32 %v1794_v46, %v1716_v44  ;;  %v1657_v52 = vor.u32 %v1777_v47, %v1654_v48  ;;  %v1644_v53 = vld [vmem:[#allocation2] sm:$0xf] }
  0x65   : > { %758 = vmatpush.bf16.msra.mxu0 %v1669_v27  ;;  %v1776_v54 = vld [vmem:[#allocation2 + $0x4] sm:$0xf0]  ;;  %v1708_v55 = vld [vmem:[#allocation2 + $0x80] sm:$0xf]  ;;  %v1721_v56 = vor.u32 %v1793_v49, %v1718_v50  ;;  %v1775_v58 = vld [vmem:[#allocation2 + $0x4] sm:$0xf] }
  0x66   : > { %1096 = vmatpush.bf16.msra.mxu2 %v1673_v29  ;;  %v1792_v57 = vld [vmem:[#allocation2 + $0x84] sm:$0xf0]  ;;  %v1646_v59 = vld [vmem:[#allocation2 + $0x8] sm:$0xf0]  ;;  %v1791_v60 = vld [vmem:[#allocation2 + $0x84] sm:$0xf]  ;;  %v1645_v62 = vor.u32 %v1776_v54, %v1644_v53 }
  0x67   : > { %926 = vmatpush.bf16.msra.mxu1 %v1741_v16  ;;  %1264 = vmatpush.bf16.msra.mxu3 %v1745_v21  ;;  %v1710_v61 = vld [vmem:[#allocation2 + $0x88] sm:$0xf0]  ;;  %v370_v63 = vld [vmem:[%s2001_s22] sm:$0xff]  ;;  %v372_v0 = vld [vmem:[%s2001_s22 + $0x10] sm:$0xff]  ;;  %v1709_v1 = vor.u32 %v1792_v57, %v1708_v55  ;;  %v1649_v2 = vor.u32 %v1775_v58, %v1646_v59  ;;  %vm1431_vm3 = vcmask 556032  }
  0x68   : > { %v371_v3 = vld [vmem:[%s2001_s22 + $0x8] sm:$0xff]  ;;  %v373_v4 = vld [vmem:[%s2001_s22 + $0x18] sm:$0xff]  ;;  %v1713_v6 = vor.u32 %v1791_v60, %v1710_v61  ;;  %v498_v7 = vpack.c.bf16 %v372_v0, %v370_v63  ;;  %v374_v9 = vld [vmem:[%s2001_s22 + $0x20] sm:$0xff] }
  0x69   : > { %759 = vmatpush.bf16.msra.mxu0 %v1661_v39  ;;  %v499_v8 = vpack.c.bf16 %v373_v4, %v371_v3  ;;  %v376_v10 = vld [vmem:[%s2001_s22 + $0x30] sm:$0xff]  ;;  %v375_v11 = vld [vmem:[%s2001_s22 + $0x28] sm:$0xff]  ;;  %v377_v12 = vld [vmem:[%s2001_s22 + $0x38] sm:$0xff] }
  0x6a   : > { %1097 = vmatpush.bf16.msra.mxu2 %v1665_v41  ;;  %v500_v13 = vpack.c.bf16 %v376_v10, %v374_v9  ;;  %v501_v14 = vpack.c.bf16 %v377_v12, %v375_v11  ;;  %v378_v15 = vld [vmem:[%s2001_s22 + $0x40] sm:$0xff]  ;;  %v380_v16 = vld [vmem:[%s2001_s22 + $0x50] sm:$0xff]  ;;  %v379_v17 = vld [vmem:[%s2001_s22 + $0x48] sm:$0xff] }
  0x6b   : > { %927 = vmatpush.bf16.msra.mxu1 %v1733_v28  ;;  %1265 = vmatpush.bf16.msra.mxu3 %v1737_v33  ;;  %v381_v18 = vld [vmem:[%s2001_s22 + $0x58] sm:$0xff]  ;;  %v502_v19 = vpack.c.bf16 %v380_v16, %v378_v15  ;;  %v382_v21 = vld [vmem:[%s2001_s22 + $0x60] sm:$0xff]  ;;  %v384_v22 = vld [vmem:[%s2001_s22 + $0x70] sm:$0xff] }
  0x6c   : > { %v503_v20 = vpack.c.bf16 %v381_v18, %v379_v17  ;;  %v383_v23 = vld [vmem:[%s2001_s22 + $0x68] sm:$0xff]  ;;  %v385_v24 = vld [vmem:[%s2001_s22 + $0x78] sm:$0xff]  ;;  %v504_v25 = vpack.c.bf16 %v384_v22, %v382_v21  ;;  %v386_v27 = vld [vmem:[%s2001_s22 + $0x80] sm:$0xff] }
  0x6d   : > { %760 = vmatpush.bf16.msra.mxu0 %v1653_v5  ;;  %v505_v26 = vpack.c.bf16 %v385_v24, %v383_v23  ;;  %v388_v28 = vld [vmem:[%s2001_s22 + $0x90] sm:$0xff]  ;;  %v387_v29 = vld [vmem:[%s2001_s22 + $0x88] sm:$0xff]  ;;  %v389_v30 = vld [vmem:[%s2001_s22 + $0x98] sm:$0xff] }
  0x6e   : > { %1098 = vmatpush.bf16.msra.mxu2 %v1657_v52  ;;  %v506_v31 = vpack.c.bf16 %v388_v28, %v386_v27  ;;  %v507_v32 = vpack.c.bf16 %v389_v30, %v387_v29  ;;  %v390_v33 = vld [vmem:[%s2001_s22 + $0xa0] sm:$0xff]  ;;  %v392_v34 = vld [vmem:[%s2001_s22 + $0xb0] sm:$0xff]  ;;  %v391_v35 = vld [vmem:[%s2001_s22 + $0xa8] sm:$0xff] }
  0x6f   : > { %928 = vmatpush.bf16.msra.mxu1 %v1725_v40  ;;  %1266 = vmatpush.bf16.msra.mxu3 %v1729_v45  ;;  %v393_v36 = vld [vmem:[%s2001_s22 + $0xb8] sm:$0xff]  ;;  %v508_v37 = vpack.c.bf16 %v392_v34, %v390_v33  ;;  %v394_v39 = vld [vmem:[%s2001_s22 + $0xc0] sm:$0xff]  ;;  %v396_v40 = vld [vmem:[%s2001_s22 + $0xd0] sm:$0xff] }
  0x70   : > { %v509_v38 = vpack.c.bf16 %v393_v36, %v391_v35  ;;  %v395_v41 = vld [vmem:[%s2001_s22 + $0xc8] sm:$0xff]  ;;  %v397_v42 = vld [vmem:[%s2001_s22 + $0xd8] sm:$0xff]  ;;  %v510_v43 = vpack.c.bf16 %v396_v40, %v394_v39  ;;  %v398_v45 = vld [vmem:[%s2001_s22 + $0xe0] sm:$0xff] }
  0x71   : > { %761 = vmatpush.bf16.msra.mxu0 %v1645_v62  ;;  %v511_v44 = vpack.c.bf16 %v397_v42, %v395_v41  ;;  %v400_v46 = vld [vmem:[%s2001_s22 + $0xf0] sm:$0xff]  ;;  %v399_v47 = vld [vmem:[%s2001_s22 + $0xe8] sm:$0xff]  ;;  %v401_v48 = vld [vmem:[%s2001_s22 + $0xf8] sm:$0xff] }
  0x72   : > { %1099 = vmatpush.bf16.msra.mxu2 %v1649_v2  ;;  %v512_v49 = vpack.c.bf16 %v400_v46, %v398_v45  ;;  %v513_v50 = vpack.c.bf16 %v401_v48, %v399_v47  ;;  %v402_v5 = vld [vmem:[%s2001_s22 + $0x100] sm:$0xff]  ;;  %v403_v52 = vld [vmem:[%s2001_s22 + $0x108] sm:$0xff]  ;;  %v405_v53 = vld [vmem:[%s2001_s22 + $0x118] sm:$0xff] }
  0x73   : > { %929 = vmatpush.bf16.msra.mxu1 %v1717_v51  ;;  %1267 = vmatpush.bf16.msra.mxu3 %v1721_v56  ;;  %v404_v51 = vld [vmem:[%s2001_s22 + $0x110] sm:$0xff]  ;;  %v515_v56 = vpack.c.bf16 %v405_v53, %v403_v52  ;;  %v407_v3 = vld [vmem:[%s2001_s22 + $0x128] sm:$0xff]  ;;  %v409_v4 = vld [vmem:[%s2001_s22 + $0x138] sm:$0xff] }
  0x74   : > { %762 = vmatmul.bf16.vlgmr.msra.gmra.mxu0 %v498_v7  ;;  %v514_v54 = vpack.c.bf16 %v404_v51, %v402_v5  ;;  %v408_v2 = vld [vmem:[%s2001_s22 + $0x130] sm:$0xff]  ;;  %v517_v10 = vpack.c.bf16 %v409_v4, %v407_v3  ;;  %v411_v22 = vld [vmem:[%s2001_s22 + $0x148] sm:$0xff]  ;;  %v413_v23 = vld [vmem:[%s2001_s22 + $0x158] sm:$0xff] }
  0x75   : > { %1100 = vmatmul.bf16.vlgmr.msra.gmra.mxu2 %v498_v7  ;;  %v412_v21 = vld [vmem:[%s2001_s22 + $0x150] sm:$0xff]  ;;  %v519_v28 = vpack.c.bf16 %v413_v23, %v411_v22  ;;  %v415_v40 = vld [vmem:[%s2001_s22 + $0x168] sm:$0xff]  ;;  %v417_v41 = vld [vmem:[%s2001_s22 + $0x178] sm:$0xff] }
  0x76   : > { %v416_v39 = vld [vmem:[%s2001_s22 + $0x170] sm:$0xff]  ;;  %v521_v46 = vpack.c.bf16 %v417_v41, %v415_v40 }
  0x77   : > { %930 = vmatpush.bf16.msra.mxu1 %v1709_v1  ;;  %1268 = vmatpush.bf16.msra.mxu3 %v1713_v6  ;;  %v406_v1 = vld [vmem:[%s2001_s22 + $0x120] sm:$0xff] }
  0x78   : > { %v516_v7 = vpack.c.bf16 %v408_v2, %v406_v1 }
  0x7a   : > { %931 = vmatmul.bf16.vlgmr.msra.gmra.mxu1 %v499_v8  ;;  %1269 = vmatmul.bf16.vlgmr.msra.gmra.mxu3 %v499_v8 }
  0x84   : > { %767 = vmatmul.bf16.gmra.mxu0 %v500_v13 }
  0x85   : > { %1105 = vmatmul.bf16.gmra.mxu2 %v500_v13 }
  0x8a   : > { %936 = vmatmul.bf16.gmra.mxu1 %v501_v14  ;;  %1274 = vmatmul.bf16.gmra.mxu3 %v501_v14 }
  0x94   : > { %772 = vmatmul.bf16.gmra.mxu0 %v502_v19 }
  0x95   : > { %1110 = vmatmul.bf16.gmra.mxu2 %v502_v19 }
  0x9a   : > { %941 = vmatmul.bf16.gmra.mxu1 %v503_v20  ;;  %1279 = vmatmul.bf16.gmra.mxu3 %v503_v20  ;;  %v410_v20 = vld [vmem:[%s2001_s22 + $0x140] sm:$0xff] }
  0xa4   : > { %777 = vmatmul.bf16.gmra.mxu0 %v504_v25 }
  0xa5   : > { %1115 = vmatmul.bf16.gmra.mxu2 %v504_v25  ;;  %v518_v25 = vpack.c.bf16 %v412_v21, %v410_v20 }
  0xaa   : > { %946 = vmatmul.bf16.gmra.mxu1 %v505_v26  ;;  %1284 = vmatmul.bf16.gmra.mxu3 %v505_v26 }
  0xb4   : > { %782 = vmatmul.bf16.gmra.mxu0 %v506_v31 }
  0xb5   : > { %1120 = vmatmul.bf16.gmra.mxu2 %v506_v31 }
  0xba   : > { %951 = vmatmul.bf16.gmra.mxu1 %v507_v32  ;;  %1289 = vmatmul.bf16.gmra.mxu3 %v507_v32 }
  0xc4   : > { %787 = vmatmul.bf16.gmra.mxu0 %v508_v37 }
  0xc5   : > { %1125 = vmatmul.bf16.gmra.mxu2 %v508_v37 }
  0xca   : > { %956 = vmatmul.bf16.gmra.mxu1 %v509_v38  ;;  %1294 = vmatmul.bf16.gmra.mxu3 %v509_v38  ;;  %v414_v38 = vld [vmem:[%s2001_s22 + $0x160] sm:$0xff] }
  0xd4   : > { %792 = vmatmul.bf16.gmra.mxu0 %v510_v43 }
  0xd5   : > { %1130 = vmatmul.bf16.gmra.mxu2 %v510_v43  ;;  %v520_v43 = vpack.c.bf16 %v416_v39, %v414_v38 }
  0xda   : > { %961 = vmatmul.bf16.gmra.mxu1 %v511_v44  ;;  %1299 = vmatmul.bf16.gmra.mxu3 %v511_v44 }
  0xe4   : > { %797 = vmatmul.bf16.gmra.mxu0 %v512_v49 }
  0xe5   : > { %1135 = vmatmul.bf16.gmra.mxu2 %v512_v49 }
  0xea   : > { %966 = vmatmul.bf16.gmra.mxu1 %v513_v50  ;;  %1304 = vmatmul.bf16.gmra.mxu3 %v513_v50 }
  0xf1   : > { %v763_v55 = vpop.f32.mrf.mxu0 }
  0xf4   : > { %802 = vmatmul.bf16.gmra.mxu0 %v514_v54 }
  0xf5   : > { %1140 = vmatmul.bf16.gmra.mxu2 %v514_v54 }
  0xf7   : > { %v932_v57 = vpop.f32.mrf.mxu1 }
  0xf8   : > { %v933_v58 = vadd.f32 %v932_v57, %v763_v55  ;;  %v1101_v59 = vpop.f32.mrf.mxu2  ;;  %v418_v55 = vld [vmem:[%s2001_s22 + $0x180] sm:$0xff]  ;;  %v419_v57 = vld [vmem:[%s2001_s22 + $0x188] sm:$0xff] }
  0xf9   : > { %v765_v61 = vpop.f32.mrf.mxu0 }
  0xfa   : > { %1430 = vst [vmem:[%s2011_s26] sm:$0xff] %v933_v58  ;;  %971 = vmatmul.bf16.gmra.mxu1 %v515_v56  ;;  %1309 = vmatmul.bf16.gmra.mxu3 %v515_v56  ;;  %v420_v56 = vld [vmem:[%s2001_s22 + $0x190] sm:$0xff]  ;;  %v421_v58 = vld [vmem:[%s2001_s22 + $0x198] sm:$0xff] }
  0xfd   : > { %v1270_v60 = vpop.f32.mrf.mxu3 }
  0xfe   : > { %v1271_v62 = vadd.f32 %v1270_v60, %v1101_v59  ;;  %v522_v60 = vpack.c.bf16 %v420_v56, %v418_v55 }
  0xff   : > { %v934_v63 = vpop.f32.mrf.mxu1 }
 0x100   : > { %v935_v0 = vadd.f32 %v934_v63, %v765_v61  ;;  %1432 = vst.msk [vmem:[%s2011_s26 + $0x8] sm:$0xff] %vm1431_vm3, %v1271_v62  ;;  %v1103_v6 = vpop.f32.mrf.mxu2  ;;  %v523_v63 = vpack.c.bf16 %v421_v58, %v419_v57 }
 0x101   : > { %v768_v9 = vpop.f32.mrf.mxu0 }
 0x102   : > { %1433 = vst [vmem:[%s2011_s26 + $0x10] sm:$0xff] %v935_v0 }
 0x104   : > { %807 = vmatmul.bf16.gmra.mxu0 %v516_v7 }
 0x105   : > { %v1272_v8 = vpop.f32.mrf.mxu3  ;;  %1145 = vmatmul.bf16.gmra.mxu2 %v516_v7 }
 0x106   : > { %v1273_v11 = vadd.f32 %v1272_v8, %v1103_v6 }
 0x107   : > { %v937_v12 = vpop.f32.mrf.mxu1 }
 0x108   : > { %v938_v13 = vadd.f32 %v937_v12, %v768_v9  ;;  %1434 = vst.msk [vmem:[%s2011_s26 + $0x18] sm:$0xff] %vm1431_vm3, %v1273_v11  ;;  %v1106_v14 = vpop.f32.mrf.mxu2  ;;  %v424_v11 = vld [vmem:[%s2001_s22 + $0x1b0] sm:$0xff]  ;;  %v423_v12 = vld [vmem:[%s2001_s22 + $0x1a8] sm:$0xff] }
 0x109   : > { %v770_v16 = vpop.f32.mrf.mxu0 }
 0x10a   : > { %1435 = vst [vmem:[%s2011_s26 + $0x20] sm:$0xff] %v938_v13  ;;  %976 = vmatmul.bf16.gmra.mxu1 %v517_v10  ;;  %1314 = vmatmul.bf16.gmra.mxu3 %v517_v10  ;;  %v422_v10 = vld [vmem:[%s2001_s22 + $0x1a0] sm:$0xff]  ;;  %v425_v13 = vld [vmem:[%s2001_s22 + $0x1b8] sm:$0xff] }
 0x10d   : > { %v1275_v15 = vpop.f32.mrf.mxu3 }
 0x10e   : > { %v1276_v17 = vadd.f32 %v1275_v15, %v1106_v14  ;;  %v524_v15 = vpack.c.bf16 %v424_v11, %v422_v10 }
 0x10f   : > { %v939_v18 = vpop.f32.mrf.mxu1 }
 0x110   : > { %v940_v19 = vadd.f32 %v939_v18, %v770_v16  ;;  %1436 = vst.msk [vmem:[%s2011_s26 + $0x28] sm:$0xff] %vm1431_vm3, %v1276_v17  ;;  %v1108_v24 = vpop.f32.mrf.mxu2  ;;  %v525_v18 = vpack.c.bf16 %v425_v13, %v423_v12 }
 0x111   : > { %v773_v27 = vpop.f32.mrf.mxu0 }
 0x112   : > { %1437 = vst [vmem:[%s2011_s26 + $0x30] sm:$0xff] %v940_v19 }
 0x114   : > { %812 = vmatmul.bf16.gmra.mxu0 %v518_v25 }
 0x115   : > { %v1277_v26 = vpop.f32.mrf.mxu3  ;;  %1150 = vmatmul.bf16.gmra.mxu2 %v518_v25 }
 0x116   : > { %v1278_v29 = vadd.f32 %v1277_v26, %v1108_v24 }
 0x117   : > { %v942_v30 = vpop.f32.mrf.mxu1 }
 0x118   : > { %v943_v31 = vadd.f32 %v942_v30, %v773_v27  ;;  %1438 = vst.msk [vmem:[%s2011_s26 + $0x38] sm:$0xff] %vm1431_vm3, %v1278_v29  ;;  %v1111_v32 = vpop.f32.mrf.mxu2  ;;  %v428_v29 = vld [vmem:[%s2001_s22 + $0x1d0] sm:$0xff]  ;;  %v427_v30 = vld [vmem:[%s2001_s22 + $0x1c8] sm:$0xff] }
 0x119   : > { %v775_v34 = vpop.f32.mrf.mxu0 }
 0x11a   : > { %1439 = vst [vmem:[%s2011_s26 + $0x40] sm:$0xff] %v943_v31  ;;  %981 = vmatmul.bf16.gmra.mxu1 %v519_v28  ;;  %1319 = vmatmul.bf16.gmra.mxu3 %v519_v28  ;;  %v426_v28 = vld [vmem:[%s2001_s22 + $0x1c0] sm:$0xff]  ;;  %v429_v31 = vld [vmem:[%s2001_s22 + $0x1d8] sm:$0xff] }
 0x11d   : > { %v1280_v33 = vpop.f32.mrf.mxu3 }
 0x11e   : > { %v1281_v35 = vadd.f32 %v1280_v33, %v1111_v32  ;;  %v526_v33 = vpack.c.bf16 %v428_v29, %v426_v28 }
 0x11f   : > { %v944_v36 = vpop.f32.mrf.mxu1 }
 0x120   : > { %v945_v37 = vadd.f32 %v944_v36, %v775_v34  ;;  %1440 = vst.msk [vmem:[%s2011_s26 + $0x48] sm:$0xff] %vm1431_vm3, %v1281_v35  ;;  %v1113_v42 = vpop.f32.mrf.mxu2  ;;  %v527_v36 = vpack.c.bf16 %v429_v31, %v427_v30 }
 0x121   : > { %v778_v45 = vpop.f32.mrf.mxu0 }
 0x122   : > { %1441 = vst [vmem:[%s2011_s26 + $0x50] sm:$0xff] %v945_v37 }
 0x124   : > { %817 = vmatmul.bf16.gmra.mxu0 %v520_v43 }
 0x125   : > { %v1282_v44 = vpop.f32.mrf.mxu3  ;;  %1155 = vmatmul.bf16.gmra.mxu2 %v520_v43 }
 0x126   : > { %v1283_v47 = vadd.f32 %v1282_v44, %v1113_v42 }
 0x127   : > { %v947_v48 = vpop.f32.mrf.mxu1 }
 0x128   : > { %v948_v49 = vadd.f32 %v947_v48, %v778_v45  ;;  %1442 = vst.msk [vmem:[%s2011_s26 + $0x58] sm:$0xff] %vm1431_vm3, %v1283_v47  ;;  %v1116_v50 = vpop.f32.mrf.mxu2  ;;  %v432_v47 = vld [vmem:[%s2001_s22 + $0x1f0] sm:$0xff]  ;;  %v431_v48 = vld [vmem:[%s2001_s22 + $0x1e8] sm:$0xff] }
 0x129   : > { %v780_v51 = vpop.f32.mrf.mxu0 }
 0x12a   : > { %1443 = vst [vmem:[%s2011_s26 + $0x60] sm:$0xff] %v948_v49  ;;  %986 = vmatmul.bf16.gmra.mxu1 %v521_v46  ;;  %1324 = vmatmul.bf16.gmra.mxu3 %v521_v46  ;;  %v430_v46 = vld [vmem:[%s2001_s22 + $0x1e0] sm:$0xff]  ;;  %v433_v49 = vld [vmem:[%s2001_s22 + $0x1f8] sm:$0xff] }
 0x12d   : > { %v1285_v5 = vpop.f32.mrf.mxu3 }
 0x12e   : > { %v1286_v52 = vadd.f32 %v1285_v5, %v1116_v50  ;;  %v528_v5 = vpack.c.bf16 %v432_v47, %v430_v46 }
 0x12f   : > { %v949_v53 = vpop.f32.mrf.mxu1 }
 0x130   : > { %v950_v54 = vadd.f32 %v949_v53, %v780_v51  ;;  %1444 = vst.msk [vmem:[%s2011_s26 + $0x68] sm:$0xff] %vm1431_vm3, %v1286_v52  ;;  %v1118_v59 = vpop.f32.mrf.mxu2  ;;  %v529_v53 = vpack.c.bf16 %v433_v49, %v431_v48 }
 0x131   : > { %v783_v62 = vpop.f32.mrf.mxu0 }
 0x132   : > { %1445 = vst [vmem:[%s2011_s26 + $0x70] sm:$0xff] %v950_v54 }
 0x134   : > { %822 = vmatmul.bf16.gmra.mxu0 %v522_v60 }
 0x135   : > { %v1287_v61 = vpop.f32.mrf.mxu3  ;;  %1160 = vmatmul.bf16.gmra.mxu2 %v522_v60 }
 0x136   : > { %v1288_v0 = vadd.f32 %v1287_v61, %v1118_v59 }
 0x137   : > { %v952_v1 = vpop.f32.mrf.mxu1 }
 0x138   : > { %v953_v2 = vadd.f32 %v952_v1, %v783_v62  ;;  %1446 = vst.msk [vmem:[%s2011_s26 + $0x78] sm:$0xff] %vm1431_vm3, %v1288_v0  ;;  %v1121_v3 = vpop.f32.mrf.mxu2  ;;  %v436_v0 = vld [vmem:[%s2001_s22 + $0x210] sm:$0xff]  ;;  %v435_v1 = vld [vmem:[%s2001_s22 + $0x208] sm:$0xff] }
 0x139   : > { %v785_v6 = vpop.f32.mrf.mxu0 }
 0x13a   : > { %1447 = vst [vmem:[%s2011_s26 + $0x80] sm:$0xff] %v953_v2  ;;  %991 = vmatmul.bf16.gmra.mxu1 %v523_v63  ;;  %1329 = vmatmul.bf16.gmra.mxu3 %v523_v63  ;;  %v434_v63 = vld [vmem:[%s2001_s22 + $0x200] sm:$0xff]  ;;  %v437_v2 = vld [vmem:[%s2001_s22 + $0x218] sm:$0xff] }
 0x13d   : > { %v1290_v4 = vpop.f32.mrf.mxu3 }
 0x13e   : > { %v1291_v7 = vadd.f32 %v1290_v4, %v1121_v3  ;;  %v530_v4 = vpack.c.bf16 %v436_v0, %v434_v63 }
 0x13f   : > { %v954_v8 = vpop.f32.mrf.mxu1 }
 0x140   : > { %v955_v9 = vadd.f32 %v954_v8, %v785_v6  ;;  %1448 = vst.msk [vmem:[%s2011_s26 + $0x88] sm:$0xff] %vm1431_vm3, %v1291_v7  ;;  %v1123_v14 = vpop.f32.mrf.mxu2  ;;  %v531_v8 = vpack.c.bf16 %v437_v2, %v435_v1 }
 0x141   : > { %v788_v17 = vpop.f32.mrf.mxu0 }
 0x142   : > { %1449 = vst [vmem:[%s2011_s26 + $0x90] sm:$0xff] %v955_v9 }
 0x144   : > { %827 = vmatmul.bf16.gmra.mxu0 %v524_v15 }
 0x145   : > { %v1292_v16 = vpop.f32.mrf.mxu3  ;;  %1165 = vmatmul.bf16.gmra.mxu2 %v524_v15 }
 0x146   : > { %v1293_v19 = vadd.f32 %v1292_v16, %v1123_v14 }
 0x147   : > { %v957_v20 = vpop.f32.mrf.mxu1 }
 0x148   : > { %v958_v21 = vadd.f32 %v957_v20, %v788_v17  ;;  %1450 = vst.msk [vmem:[%s2011_s26 + $0x98] sm:$0xff] %vm1431_vm3, %v1293_v19  ;;  %v1126_v22 = vpop.f32.mrf.mxu2  ;;  %v440_v19 = vld [vmem:[%s2001_s22 + $0x230] sm:$0xff]  ;;  %v439_v20 = vld [vmem:[%s2001_s22 + $0x228] sm:$0xff] }
 0x149   : > { %v790_v24 = vpop.f32.mrf.mxu0 }
 0x14a   : > { %1451 = vst [vmem:[%s2011_s26 + $0xa0] sm:$0xff] %v958_v21  ;;  %996 = vmatmul.bf16.gmra.mxu1 %v525_v18  ;;  %1334 = vmatmul.bf16.gmra.mxu3 %v525_v18  ;;  %v438_v18 = vld [vmem:[%s2001_s22 + $0x220] sm:$0xff]  ;;  %v441_v21 = vld [vmem:[%s2001_s22 + $0x238] sm:$0xff] }
 0x14d   : > { %v1295_v23 = vpop.f32.mrf.mxu3 }
 0x14e   : > { %v1296_v25 = vadd.f32 %v1295_v23, %v1126_v22  ;;  %v532_v23 = vpack.c.bf16 %v440_v19, %v438_v18 }
 0x14f   : > { %v959_v26 = vpop.f32.mrf.mxu1 }
 0x150   : > { %v960_v27 = vadd.f32 %v959_v26, %v790_v24  ;;  %1452 = vst.msk [vmem:[%s2011_s26 + $0xa8] sm:$0xff] %vm1431_vm3, %v1296_v25  ;;  %v1128_v32 = vpop.f32.mrf.mxu2  ;;  %v533_v26 = vpack.c.bf16 %v441_v21, %v439_v20 }
 0x151   : > { %v793_v35 = vpop.f32.mrf.mxu0 }
 0x152   : > { %1453 = vst [vmem:[%s2011_s26 + $0xb0] sm:$0xff] %v960_v27 }
 0x154   : > { %832 = vmatmul.bf16.gmra.mxu0 %v526_v33 }
 0x155   : > { %v1297_v34 = vpop.f32.mrf.mxu3  ;;  %1170 = vmatmul.bf16.gmra.mxu2 %v526_v33 }
 0x156   : > { %v1298_v37 = vadd.f32 %v1297_v34, %v1128_v32 }
 0x157   : > { %v962_v38 = vpop.f32.mrf.mxu1 }
 0x158   : > { %v963_v39 = vadd.f32 %v962_v38, %v793_v35  ;;  %1454 = vst.msk [vmem:[%s2011_s26 + $0xb8] sm:$0xff] %vm1431_vm3, %v1298_v37  ;;  %v1131_v40 = vpop.f32.mrf.mxu2  ;;  %v444_v37 = vld [vmem:[%s2001_s22 + $0x250] sm:$0xff]  ;;  %v443_v38 = vld [vmem:[%s2001_s22 + $0x248] sm:$0xff] }
 0x159   : > { %v795_v42 = vpop.f32.mrf.mxu0 }
 0x15a   : > { %1455 = vst [vmem:[%s2011_s26 + $0xc0] sm:$0xff] %v963_v39  ;;  %1001 = vmatmul.bf16.gmra.mxu1 %v527_v36  ;;  %1339 = vmatmul.bf16.gmra.mxu3 %v527_v36  ;;  %v442_v36 = vld [vmem:[%s2001_s22 + $0x240] sm:$0xff]  ;;  %v445_v39 = vld [vmem:[%s2001_s22 + $0x258] sm:$0xff] }
 0x15d   : > { %v1300_v41 = vpop.f32.mrf.mxu3 }
 0x15e   : > { %v1301_v43 = vadd.f32 %v1300_v41, %v1131_v40  ;;  %v534_v41 = vpack.c.bf16 %v444_v37, %v442_v36 }
 0x15f   : > { %v964_v44 = vpop.f32.mrf.mxu1 }
 0x160   : > { %v965_v45 = vadd.f32 %v964_v44, %v795_v42  ;;  %1456 = vst.msk [vmem:[%s2011_s26 + $0xc8] sm:$0xff] %vm1431_vm3, %v1301_v43  ;;  %v1133_v50 = vpop.f32.mrf.mxu2  ;;  %v535_v44 = vpack.c.bf16 %v445_v39, %v443_v38 }
 0x161   : > { %v798_v52 = vpop.f32.mrf.mxu0 }
 0x162   : > { %1457 = vst [vmem:[%s2011_s26 + $0xd0] sm:$0xff] %v965_v45 }
 0x164   : > { %837 = vmatmul.bf16.gmra.mxu0 %v528_v5 }
 0x165   : > { %v1302_v51 = vpop.f32.mrf.mxu3  ;;  %1175 = vmatmul.bf16.gmra.mxu2 %v528_v5 }
 0x166   : > { %v1303_v54 = vadd.f32 %v1302_v51, %v1133_v50 }
 0x167   : > { %v967_v55 = vpop.f32.mrf.mxu1 }
 0x168   : > { %v968_v56 = vadd.f32 %v967_v55, %v798_v52  ;;  %1458 = vst.msk [vmem:[%s2011_s26 + $0xd8] sm:$0xff] %vm1431_vm3, %v1303_v54  ;;  %v1136_v57 = vpop.f32.mrf.mxu2  ;;  %v448_v54 = vld [vmem:[%s2001_s22 + $0x270] sm:$0xff]  ;;  %v447_v55 = vld [vmem:[%s2001_s22 + $0x268] sm:$0xff] }
 0x169   : > { %v800_v59 = vpop.f32.mrf.mxu0 }
 0x16a   : > { %1459 = vst [vmem:[%s2011_s26 + $0xe0] sm:$0xff] %v968_v56  ;;  %1006 = vmatmul.bf16.gmra.mxu1 %v529_v53  ;;  %1344 = vmatmul.bf16.gmra.mxu3 %v529_v53  ;;  %v446_v53 = vld [vmem:[%s2001_s22 + $0x260] sm:$0xff]  ;;  %v449_v56 = vld [vmem:[%s2001_s22 + $0x278] sm:$0xff] }
 0x16d   : > { %v1305_v58 = vpop.f32.mrf.mxu3 }
 0x16e   : > { %v1306_v60 = vadd.f32 %v1305_v58, %v1136_v57  ;;  %v536_v58 = vpack.c.bf16 %v448_v54, %v446_v53 }
 0x16f   : > { %v969_v61 = vpop.f32.mrf.mxu1 }
 0x170   : > { %v970_v62 = vadd.f32 %v969_v61, %v800_v59  ;;  %1460 = vst.msk [vmem:[%s2011_s26 + $0xe8] sm:$0xff] %vm1431_vm3, %v1306_v60  ;;  %v1138_v3 = vpop.f32.mrf.mxu2  ;;  %v537_v61 = vpack.c.bf16 %v449_v56, %v447_v55 }
 0x171   : > { %v803_v7 = vpop.f32.mrf.mxu0 }
 0x172   : > { %1461 = vst [vmem:[%s2011_s26 + $0xf0] sm:$0xff] %v970_v62 }
 0x174   : > { %842 = vmatmul.bf16.gmra.mxu0 %v530_v4 }
 0x175   : > { %v1307_v6 = vpop.f32.mrf.mxu3  ;;  %1180 = vmatmul.bf16.gmra.mxu2 %v530_v4 }
 0x176   : > { %v1308_v9 = vadd.f32 %v1307_v6, %v1138_v3 }
 0x177   : > { %v972_v10 = vpop.f32.mrf.mxu1 }
 0x178   : > { %v973_v11 = vadd.f32 %v972_v10, %v803_v7  ;;  %1462 = vst.msk [vmem:[%s2011_s26 + $0xf8] sm:$0xff] %vm1431_vm3, %v1308_v9  ;;  %v1141_v12 = vpop.f32.mrf.mxu2  ;;  %v452_v9 = vld [vmem:[%s2001_s22 + $0x290] sm:$0xff]  ;;  %v451_v10 = vld [vmem:[%s2001_s22 + $0x288] sm:$0xff] }
 0x179   : > { %v805_v14 = vpop.f32.mrf.mxu0 }
 0x17a   : > { %1463 = vst [vmem:[%s2011_s26 + $0x100] sm:$0xff] %v973_v11  ;;  %1011 = vmatmul.bf16.gmra.mxu1 %v531_v8  ;;  %1349 = vmatmul.bf16.gmra.mxu3 %v531_v8  ;;  %v450_v8 = vld [vmem:[%s2001_s22 + $0x280] sm:$0xff]  ;;  %v453_v11 = vld [vmem:[%s2001_s22 + $0x298] sm:$0xff] }
 0x17d   : > { %v1310_v13 = vpop.f32.mrf.mxu3 }
 0x17e   : > { %v1311_v15 = vadd.f32 %v1310_v13, %v1141_v12  ;;  %v538_v13 = vpack.c.bf16 %v452_v9, %v450_v8 }
 0x17f   : > { %v974_v16 = vpop.f32.mrf.mxu1 }
 0x180   : > { %v975_v17 = vadd.f32 %v974_v16, %v805_v14  ;;  %1464 = vst.msk [vmem:[%s2011_s26 + $0x108] sm:$0xff] %vm1431_vm3, %v1311_v15  ;;  %v1143_v22 = vpop.f32.mrf.mxu2  ;;  %v539_v16 = vpack.c.bf16 %v453_v11, %v451_v10 }
 0x181   : > { %v808_v25 = vpop.f32.mrf.mxu0 }
 0x182   : > { %1465 = vst [vmem:[%s2011_s26 + $0x110] sm:$0xff] %v975_v17 }
 0x184   : > { %847 = vmatmul.bf16.gmra.mxu0 %v532_v23 }
 0x185   : > { %v1312_v24 = vpop.f32.mrf.mxu3  ;;  %1185 = vmatmul.bf16.gmra.mxu2 %v532_v23 }
 0x186   : > { %v1313_v27 = vadd.f32 %v1312_v24, %v1143_v22 }
 0x187   : > { %v977_v28 = vpop.f32.mrf.mxu1 }
 0x188   : > { %v978_v29 = vadd.f32 %v977_v28, %v808_v25  ;;  %1466 = vst.msk [vmem:[%s2011_s26 + $0x118] sm:$0xff] %vm1431_vm3, %v1313_v27  ;;  %v1146_v30 = vpop.f32.mrf.mxu2  ;;  %v456_v27 = vld [vmem:[%s2001_s22 + $0x2b0] sm:$0xff]  ;;  %v455_v28 = vld [vmem:[%s2001_s22 + $0x2a8] sm:$0xff] }
 0x189   : > { %v810_v32 = vpop.f32.mrf.mxu0 }
 0x18a   : > { %1467 = vst [vmem:[%s2011_s26 + $0x120] sm:$0xff] %v978_v29  ;;  %1016 = vmatmul.bf16.gmra.mxu1 %v533_v26  ;;  %1354 = vmatmul.bf16.gmra.mxu3 %v533_v26  ;;  %v454_v26 = vld [vmem:[%s2001_s22 + $0x2a0] sm:$0xff]  ;;  %v457_v29 = vld [vmem:[%s2001_s22 + $0x2b8] sm:$0xff] }
 0x18d   : > { %v1315_v31 = vpop.f32.mrf.mxu3 }
 0x18e   : > { %v1316_v33 = vadd.f32 %v1315_v31, %v1146_v30  ;;  %v540_v31 = vpack.c.bf16 %v456_v27, %v454_v26 }
 0x18f   : > { %v979_v34 = vpop.f32.mrf.mxu1 }
 0x190   : > { %v980_v35 = vadd.f32 %v979_v34, %v810_v32  ;;  %1468 = vst.msk [vmem:[%s2011_s26 + $0x128] sm:$0xff] %vm1431_vm3, %v1316_v33  ;;  %v1148_v40 = vpop.f32.mrf.mxu2  ;;  %v541_v34 = vpack.c.bf16 %v457_v29, %v455_v28 }
 0x191   : > { %v813_v43 = vpop.f32.mrf.mxu0 }
 0x192   : > { %1469 = vst [vmem:[%s2011_s26 + $0x130] sm:$0xff] %v980_v35 }
 0x194   : > { %852 = vmatmul.bf16.gmra.mxu0 %v534_v41 }
 0x195   : > { %v1317_v42 = vpop.f32.mrf.mxu3  ;;  %1190 = vmatmul.bf16.gmra.mxu2 %v534_v41 }
 0x196   : > { %v1318_v45 = vadd.f32 %v1317_v42, %v1148_v40 }
 0x197   : > { %v982_v46 = vpop.f32.mrf.mxu1 }
 0x198   : > { %v983_v47 = vadd.f32 %v982_v46, %v813_v43  ;;  %1470 = vst.msk [vmem:[%s2011_s26 + $0x138] sm:$0xff] %vm1431_vm3, %v1318_v45  ;;  %v1151_v48 = vpop.f32.mrf.mxu2  ;;  %v460_v45 = vld [vmem:[%s2001_s22 + $0x2d0] sm:$0xff]  ;;  %v459_v46 = vld [vmem:[%s2001_s22 + $0x2c8] sm:$0xff] }
 0x199   : > { %v815_v50 = vpop.f32.mrf.mxu0 }
 0x19a   : > { %1471 = vst [vmem:[%s2011_s26 + $0x140] sm:$0xff] %v983_v47  ;;  %1021 = vmatmul.bf16.gmra.mxu1 %v535_v44  ;;  %1359 = vmatmul.bf16.gmra.mxu3 %v535_v44  ;;  %v458_v44 = vld [vmem:[%s2001_s22 + $0x2c0] sm:$0xff]  ;;  %v461_v47 = vld [vmem:[%s2001_s22 + $0x2d8] sm:$0xff] }
 0x19d   : > { %v1320_v49 = vpop.f32.mrf.mxu3 }
 0x19e   : > { %v1321_v5 = vadd.f32 %v1320_v49, %v1151_v48  ;;  %v542_v49 = vpack.c.bf16 %v460_v45, %v458_v44 }
 0x19f   : > { %v984_v51 = vpop.f32.mrf.mxu1 }
 0x1a0   : > { %v985_v52 = vadd.f32 %v984_v51, %v815_v50  ;;  %1472 = vst.msk [vmem:[%s2011_s26 + $0x148] sm:$0xff] %vm1431_vm3, %v1321_v5  ;;  %v1153_v57 = vpop.f32.mrf.mxu2  ;;  %v543_v51 = vpack.c.bf16 %v461_v47, %v459_v46 }
 0x1a1   : > { %v818_v60 = vpop.f32.mrf.mxu0 }
 0x1a2   : > { %1473 = vst [vmem:[%s2011_s26 + $0x150] sm:$0xff] %v985_v52 }
 0x1a4   : > { %857 = vmatmul.bf16.gmra.mxu0 %v536_v58 }
 0x1a5   : > { %v1322_v59 = vpop.f32.mrf.mxu3  ;;  %1195 = vmatmul.bf16.gmra.mxu2 %v536_v58 }
 0x1a6   : > { %v1323_v62 = vadd.f32 %v1322_v59, %v1153_v57 }
 0x1a7   : > { %v987_v63 = vpop.f32.mrf.mxu1 }
 0x1a8   : > { %v988_v0 = vadd.f32 %v987_v63, %v818_v60  ;;  %1474 = vst.msk [vmem:[%s2011_s26 + $0x158] sm:$0xff] %vm1431_vm3, %v1323_v62  ;;  %v1156_v1 = vpop.f32.mrf.mxu2  ;;  %v464_v62 = vld [vmem:[%s2001_s22 + $0x2f0] sm:$0xff]  ;;  %v463_v63 = vld [vmem:[%s2001_s22 + $0x2e8] sm:$0xff] }
 0x1a9   : > { %v820_v3 = vpop.f32.mrf.mxu0 }
 0x1aa   : > { %1475 = vst [vmem:[%s2011_s26 + $0x160] sm:$0xff] %v988_v0  ;;  %1026 = vmatmul.bf16.gmra.mxu1 %v537_v61  ;;  %1364 = vmatmul.bf16.gmra.mxu3 %v537_v61  ;;  %v462_v61 = vld [vmem:[%s2001_s22 + $0x2e0] sm:$0xff]  ;;  %v465_v0 = vld [vmem:[%s2001_s22 + $0x2f8] sm:$0xff] }
 0x1ad   : > { %v1325_v2 = vpop.f32.mrf.mxu3 }
 0x1ae   : > { %v1326_v4 = vadd.f32 %v1325_v2, %v1156_v1  ;;  %v544_v2 = vpack.c.bf16 %v464_v62, %v462_v61 }
 0x1af   : > { %v989_v6 = vpop.f32.mrf.mxu1 }
 0x1b0   : > { %v990_v7 = vadd.f32 %v989_v6, %v820_v3  ;;  %1476 = vst.msk [vmem:[%s2011_s26 + $0x168] sm:$0xff] %vm1431_vm3, %v1326_v4  ;;  %v1158_v12 = vpop.f32.mrf.mxu2  ;;  %v545_v6 = vpack.c.bf16 %v465_v0, %v463_v63 }
 0x1b1   : > { %v823_v15 = vpop.f32.mrf.mxu0 }
 0x1b2   : > { %1477 = vst [vmem:[%s2011_s26 + $0x170] sm:$0xff] %v990_v7 }
 0x1b4   : > { %862 = vmatmul.bf16.gmra.mxu0 %v538_v13 }
 0x1b5   : > { %v1327_v14 = vpop.f32.mrf.mxu3  ;;  %1200 = vmatmul.bf16.gmra.mxu2 %v538_v13 }
 0x1b6   : > { %v1328_v17 = vadd.f32 %v1327_v14, %v1158_v12 }
 0x1b7   : > { %v992_v18 = vpop.f32.mrf.mxu1 }
 0x1b8   : > { %v993_v19 = vadd.f32 %v992_v18, %v823_v15  ;;  %1478 = vst.msk [vmem:[%s2011_s26 + $0x178] sm:$0xff] %vm1431_vm3, %v1328_v17  ;;  %v1161_v20 = vpop.f32.mrf.mxu2  ;;  %v468_v17 = vld [vmem:[%s2001_s22 + $0x310] sm:$0xff]  ;;  %v467_v18 = vld [vmem:[%s2001_s22 + $0x308] sm:$0xff] }
 0x1b9   : > { %v825_v22 = vpop.f32.mrf.mxu0 }
 0x1ba   : > { %1479 = vst [vmem:[%s2011_s26 + $0x180] sm:$0xff] %v993_v19  ;;  %1031 = vmatmul.bf16.gmra.mxu1 %v539_v16  ;;  %1369 = vmatmul.bf16.gmra.mxu3 %v539_v16  ;;  %v466_v16 = vld [vmem:[%s2001_s22 + $0x300] sm:$0xff]  ;;  %v469_v19 = vld [vmem:[%s2001_s22 + $0x318] sm:$0xff] }
 0x1bd   : > { %v1330_v21 = vpop.f32.mrf.mxu3 }
 0x1be   : > { %v1331_v23 = vadd.f32 %v1330_v21, %v1161_v20  ;;  %v546_v21 = vpack.c.bf16 %v468_v17, %v466_v16 }
 0x1bf   : > { %v994_v24 = vpop.f32.mrf.mxu1 }
 0x1c0   : > { %v995_v25 = vadd.f32 %v994_v24, %v825_v22  ;;  %1480 = vst.msk [vmem:[%s2011_s26 + $0x188] sm:$0xff] %vm1431_vm3, %v1331_v23  ;;  %v1163_v30 = vpop.f32.mrf.mxu2  ;;  %v547_v24 = vpack.c.bf16 %v469_v19, %v467_v18 }
 0x1c1   : > { %v828_v33 = vpop.f32.mrf.mxu0 }
 0x1c2   : > { %1481 = vst [vmem:[%s2011_s26 + $0x190] sm:$0xff] %v995_v25 }
 0x1c4   : > { %867 = vmatmul.bf16.gmra.mxu0 %v540_v31 }
 0x1c5   : > { %v1332_v32 = vpop.f32.mrf.mxu3  ;;  %1205 = vmatmul.bf16.gmra.mxu2 %v540_v31 }
 0x1c6   : > { %v1333_v35 = vadd.f32 %v1332_v32, %v1163_v30 }
 0x1c7   : > { %v997_v36 = vpop.f32.mrf.mxu1 }
 0x1c8   : > { %v998_v37 = vadd.f32 %v997_v36, %v828_v33  ;;  %1482 = vst.msk [vmem:[%s2011_s26 + $0x198] sm:$0xff] %vm1431_vm3, %v1333_v35  ;;  %v1166_v38 = vpop.f32.mrf.mxu2  ;;  %v472_v35 = vld [vmem:[%s2001_s22 + $0x330] sm:$0xff]  ;;  %v471_v36 = vld [vmem:[%s2001_s22 + $0x328] sm:$0xff] }
 0x1c9   : > { %v830_v40 = vpop.f32.mrf.mxu0 }
 0x1ca   : > { %1483 = vst [vmem:[%s2011_s26 + $0x1a0] sm:$0xff] %v998_v37  ;;  %1036 = vmatmul.bf16.gmra.mxu1 %v541_v34  ;;  %1374 = vmatmul.bf16.gmra.mxu3 %v541_v34  ;;  %v470_v34 = vld [vmem:[%s2001_s22 + $0x320] sm:$0xff]  ;;  %v473_v37 = vld [vmem:[%s2001_s22 + $0x338] sm:$0xff] }
 0x1cd   : > { %v1335_v39 = vpop.f32.mrf.mxu3 }
 0x1ce   : > { %v1336_v41 = vadd.f32 %v1335_v39, %v1166_v38  ;;  %v548_v39 = vpack.c.bf16 %v472_v35, %v470_v34 }
 0x1cf   : > { %v999_v42 = vpop.f32.mrf.mxu1 }
 0x1d0   : > { %v1000_v43 = vadd.f32 %v999_v42, %v830_v40  ;;  %1484 = vst.msk [vmem:[%s2011_s26 + $0x1a8] sm:$0xff] %vm1431_vm3, %v1336_v41  ;;  %v1168_v48 = vpop.f32.mrf.mxu2  ;;  %v549_v42 = vpack.c.bf16 %v473_v37, %v471_v36 }
 0x1d1   : > { %v833_v5 = vpop.f32.mrf.mxu0 }
 0x1d2   : > { %1485 = vst [vmem:[%s2011_s26 + $0x1b0] sm:$0xff] %v1000_v43 }
 0x1d4   : > { %872 = vmatmul.bf16.gmra.mxu0 %v542_v49 }
 0x1d5   : > { %v1337_v50 = vpop.f32.mrf.mxu3  ;;  %1210 = vmatmul.bf16.gmra.mxu2 %v542_v49 }
 0x1d6   : > { %v1338_v52 = vadd.f32 %v1337_v50, %v1168_v48 }
 0x1d7   : > { %v1002_v53 = vpop.f32.mrf.mxu1 }
 0x1d8   : > { %v1003_v54 = vadd.f32 %v1002_v53, %v833_v5  ;;  %1486 = vst.msk [vmem:[%s2011_s26 + $0x1b8] sm:$0xff] %vm1431_vm3, %v1338_v52  ;;  %v1171_v55 = vpop.f32.mrf.mxu2  ;;  %v476_v52 = vld [vmem:[%s2001_s22 + $0x350] sm:$0xff]  ;;  %v475_v53 = vld [vmem:[%s2001_s22 + $0x348] sm:$0xff] }
 0x1d9   : > { %v835_v57 = vpop.f32.mrf.mxu0 }
 0x1da   : > { %1487 = vst [vmem:[%s2011_s26 + $0x1c0] sm:$0xff] %v1003_v54  ;;  %1041 = vmatmul.bf16.gmra.mxu1 %v543_v51  ;;  %1379 = vmatmul.bf16.gmra.mxu3 %v543_v51  ;;  %v474_v51 = vld [vmem:[%s2001_s22 + $0x340] sm:$0xff]  ;;  %v477_v54 = vld [vmem:[%s2001_s22 + $0x358] sm:$0xff] }
 0x1dd   : > { %v1340_v56 = vpop.f32.mrf.mxu3 }
 0x1de   : > { %v1341_v58 = vadd.f32 %v1340_v56, %v1171_v55  ;;  %v550_v56 = vpack.c.bf16 %v476_v52, %v474_v51 }
 0x1df   : > { %v1004_v59 = vpop.f32.mrf.mxu1 }
 0x1e0   : > { %v1005_v60 = vadd.f32 %v1004_v59, %v835_v57  ;;  %1488 = vst.msk [vmem:[%s2011_s26 + $0x1c8] sm:$0xff] %vm1431_vm3, %v1341_v58  ;;  %v1173_v1 = vpop.f32.mrf.mxu2  ;;  %v551_v59 = vpack.c.bf16 %v477_v54, %v475_v53 }
 0x1e1   : > { %v838_v4 = vpop.f32.mrf.mxu0 }
 0x1e2   : > { %1489 = vst [vmem:[%s2011_s26 + $0x1d0] sm:$0xff] %v1005_v60 }
 0x1e4   : > { %877 = vmatmul.bf16.gmra.mxu0 %v544_v2 }
 0x1e5   : > { %v1342_v3 = vpop.f32.mrf.mxu3  ;;  %1215 = vmatmul.bf16.gmra.mxu2 %v544_v2 }
 0x1e6   : > { %v1343_v7 = vadd.f32 %v1342_v3, %v1173_v1 }
 0x1e7   : > { %v1007_v8 = vpop.f32.mrf.mxu1 }
 0x1e8   : > { %v1008_v9 = vadd.f32 %v1007_v8, %v838_v4  ;;  %1490 = vst.msk [vmem:[%s2011_s26 + $0x1d8] sm:$0xff] %vm1431_vm3, %v1343_v7  ;;  %v1176_v10 = vpop.f32.mrf.mxu2  ;;  %v480_v7 = vld [vmem:[%s2001_s22 + $0x370] sm:$0xff]  ;;  %v479_v8 = vld [vmem:[%s2001_s22 + $0x368] sm:$0xff] }
 0x1e9   : > { %v840_v12 = vpop.f32.mrf.mxu0 }
 0x1ea   : > { %1491 = vst [vmem:[%s2011_s26 + $0x1e0] sm:$0xff] %v1008_v9  ;;  %1046 = vmatmul.bf16.gmra.mxu1 %v545_v6  ;;  %1384 = vmatmul.bf16.gmra.mxu3 %v545_v6  ;;  %v478_v6 = vld [vmem:[%s2001_s22 + $0x360] sm:$0xff]  ;;  %v481_v9 = vld [vmem:[%s2001_s22 + $0x378] sm:$0xff] }
 0x1ed   : > { %v1345_v11 = vpop.f32.mrf.mxu3 }
 0x1ee   : > { %v1346_v13 = vadd.f32 %v1345_v11, %v1176_v10  ;;  %v552_v11 = vpack.c.bf16 %v480_v7, %v478_v6 }
 0x1ef   : > { %v1009_v14 = vpop.f32.mrf.mxu1 }
 0x1f0   : > { %v1010_v15 = vadd.f32 %v1009_v14, %v840_v12  ;;  %1492 = vst.msk [vmem:[%s2011_s26 + $0x1e8] sm:$0xff] %vm1431_vm3, %v1346_v13  ;;  %v1178_v20 = vpop.f32.mrf.mxu2  ;;  %v553_v14 = vpack.c.bf16 %v481_v9, %v479_v8 }
 0x1f1   : > { %v843_v23 = vpop.f32.mrf.mxu0 }
 0x1f2   : > { %1493 = vst [vmem:[%s2011_s26 + $0x1f0] sm:$0xff] %v1010_v15 }
 0x1f4   : > { %882 = vmatmul.bf16.gmra.mxu0 %v546_v21 }
 0x1f5   : > { %v1347_v22 = vpop.f32.mrf.mxu3  ;;  %1220 = vmatmul.bf16.gmra.mxu2 %v546_v21 }
 0x1f6   : > { %v1348_v25 = vadd.f32 %v1347_v22, %v1178_v20 }
 0x1f7   : > { %v1012_v26 = vpop.f32.mrf.mxu1 }
 0x1f8   : > { %v1013_v27 = vadd.f32 %v1012_v26, %v843_v23  ;;  %1494 = vst.msk [vmem:[%s2011_s26 + $0x1f8] sm:$0xff] %vm1431_vm3, %v1348_v25  ;;  %v1181_v28 = vpop.f32.mrf.mxu2  ;;  %v484_v25 = vld [vmem:[%s2001_s22 + $0x390] sm:$0xff]  ;;  %v483_v26 = vld [vmem:[%s2001_s22 + $0x388] sm:$0xff] }
 0x1f9   : > { %v845_v30 = vpop.f32.mrf.mxu0 }
 0x1fa   : > { %1495 = vst [vmem:[%s2011_s26 + $0x200] sm:$0xff] %v1013_v27  ;;  %1051 = vmatmul.bf16.gmra.mxu1 %v547_v24  ;;  %1389 = vmatmul.bf16.gmra.mxu3 %v547_v24  ;;  %v482_v24 = vld [vmem:[%s2001_s22 + $0x380] sm:$0xff]  ;;  %v485_v27 = vld [vmem:[%s2001_s22 + $0x398] sm:$0xff] }
 0x1fd   : > { %v1350_v29 = vpop.f32.mrf.mxu3 }
 0x1fe   : > { %v1351_v31 = vadd.f32 %v1350_v29, %v1181_v28  ;;  %v554_v29 = vpack.c.bf16 %v484_v25, %v482_v24 }
 0x1ff   : > { %v1014_v32 = vpop.f32.mrf.mxu1 }
 0x200   : > { %v1015_v33 = vadd.f32 %v1014_v32, %v845_v30  ;;  %1496 = vst.msk [vmem:[%s2011_s26 + $0x208] sm:$0xff] %vm1431_vm3, %v1351_v31  ;;  %v1183_v38 = vpop.f32.mrf.mxu2  ;;  %v555_v32 = vpack.c.bf16 %v485_v27, %v483_v26 }
 0x201   : > { %v848_v41 = vpop.f32.mrf.mxu0 }
 0x202   : > { %1497 = vst [vmem:[%s2011_s26 + $0x210] sm:$0xff] %v1015_v33 }
 0x204   : > { %887 = vmatmul.bf16.gmra.mxu0 %v548_v39 }
 0x205   : > { %v1352_v40 = vpop.f32.mrf.mxu3  ;;  %1225 = vmatmul.bf16.gmra.mxu2 %v548_v39 }
 0x206   : > { %v1353_v43 = vadd.f32 %v1352_v40, %v1183_v38 }
 0x207   : > { %v1017_v44 = vpop.f32.mrf.mxu1 }
 0x208   : > { %v1018_v45 = vadd.f32 %v1017_v44, %v848_v41  ;;  %1498 = vst.msk [vmem:[%s2011_s26 + $0x218] sm:$0xff] %vm1431_vm3, %v1353_v43  ;;  %v1186_v46 = vpop.f32.mrf.mxu2  ;;  %v488_v43 = vld [vmem:[%s2001_s22 + $0x3b0] sm:$0xff]  ;;  %v487_v44 = vld [vmem:[%s2001_s22 + $0x3a8] sm:$0xff] }
 0x209   : > { %v850_v48 = vpop.f32.mrf.mxu0 }
 0x20a   : > { %1499 = vst [vmem:[%s2011_s26 + $0x220] sm:$0xff] %v1018_v45  ;;  %1056 = vmatmul.bf16.gmra.mxu1 %v549_v42  ;;  %1394 = vmatmul.bf16.gmra.mxu3 %v549_v42  ;;  %v486_v42 = vld [vmem:[%s2001_s22 + $0x3a0] sm:$0xff]  ;;  %v489_v45 = vld [vmem:[%s2001_s22 + $0x3b8] sm:$0xff] }
 0x20d   : > { %v1355_v47 = vpop.f32.mrf.mxu3 }
 0x20e   : > { %v1356_v49 = vadd.f32 %v1355_v47, %v1186_v46  ;;  %v556_v47 = vpack.c.bf16 %v488_v43, %v486_v42 }
 0x20f   : > { %v1019_v50 = vpop.f32.mrf.mxu1 }
 0x210   : > { %v1020_v5 = vadd.f32 %v1019_v50, %v850_v48  ;;  %1500 = vst.msk [vmem:[%s2011_s26 + $0x228] sm:$0xff] %vm1431_vm3, %v1356_v49  ;;  %v1188_v55 = vpop.f32.mrf.mxu2  ;;  %v557_v50 = vpack.c.bf16 %v489_v45, %v487_v44 }
 0x211   : > { %v853_v58 = vpop.f32.mrf.mxu0 }
 0x212   : > { %1501 = vst [vmem:[%s2011_s26 + $0x230] sm:$0xff] %v1020_v5 }
 0x214   : > { %892 = vmatmul.bf16.gmra.mxu0 %v550_v56 }
 0x215   : > { %v1357_v57 = vpop.f32.mrf.mxu3  ;;  %1230 = vmatmul.bf16.gmra.mxu2 %v550_v56 }
 0x216   : > { %v1358_v60 = vadd.f32 %v1357_v57, %v1188_v55 }
 0x217   : > { %v1022_v61 = vpop.f32.mrf.mxu1 }
 0x218   : > { %v1023_v62 = vadd.f32 %v1022_v61, %v853_v58  ;;  %1502 = vst.msk [vmem:[%s2011_s26 + $0x238] sm:$0xff] %vm1431_vm3, %v1358_v60  ;;  %v1191_v63 = vpop.f32.mrf.mxu2  ;;  %v492_v60 = vld [vmem:[%s2001_s22 + $0x3d0] sm:$0xff]  ;;  %v491_v61 = vld [vmem:[%s2001_s22 + $0x3c8] sm:$0xff] }
 0x219   : > { %v855_v1 = vpop.f32.mrf.mxu0 }
 0x21a   : > { %1503 = vst [vmem:[%s2011_s26 + $0x240] sm:$0xff] %v1023_v62  ;;  %1061 = vmatmul.bf16.gmra.mxu1 %v551_v59  ;;  %1399 = vmatmul.bf16.gmra.mxu3 %v551_v59  ;;  %v490_v59 = vld [vmem:[%s2001_s22 + $0x3c0] sm:$0xff]  ;;  %v493_v62 = vld [vmem:[%s2001_s22 + $0x3d8] sm:$0xff] }
 0x21d   : > { %v1360_v0 = vpop.f32.mrf.mxu3 }
 0x21e   : > { %v1361_v2 = vadd.f32 %v1360_v0, %v1191_v63  ;;  %v558_v0 = vpack.c.bf16 %v492_v60, %v490_v59 }
 0x21f   : > { %v1024_v3 = vpop.f32.mrf.mxu1 }
 0x220   : > { %v1025_v4 = vadd.f32 %v1024_v3, %v855_v1  ;;  %1504 = vst.msk [vmem:[%s2011_s26 + $0x248] sm:$0xff] %vm1431_vm3, %v1361_v2  ;;  %v1193_v10 = vpop.f32.mrf.mxu2  ;;  %v559_v3 = vpack.c.bf16 %v493_v62, %v491_v61 }
 0x221   : > { %v858_v13 = vpop.f32.mrf.mxu0 }
 0x222   : > { %1505 = vst [vmem:[%s2011_s26 + $0x250] sm:$0xff] %v1025_v4 }
 0x224   : > { %897 = vmatmul.bf16.gmra.mxu0 %v552_v11 }
 0x225   : > { %v1362_v12 = vpop.f32.mrf.mxu3  ;;  %1235 = vmatmul.bf16.gmra.mxu2 %v552_v11 }
 0x226   : > { %v1363_v15 = vadd.f32 %v1362_v12, %v1193_v10 }
 0x227   : > { %v1027_v16 = vpop.f32.mrf.mxu1 }
 0x228   : > { %v1028_v17 = vadd.f32 %v1027_v16, %v858_v13  ;;  %1506 = vst.msk [vmem:[%s2011_s26 + $0x258] sm:$0xff] %vm1431_vm3, %v1363_v15  ;;  %v1196_v18 = vpop.f32.mrf.mxu2  ;;  %v496_v15 = vld [vmem:[%s2001_s22 + $0x3f0] sm:$0xff]  ;;  %v495_v16 = vld [vmem:[%s2001_s22 + $0x3e8] sm:$0xff] }
 0x229   : > { %v860_v20 = vpop.f32.mrf.mxu0 }
 0x22a   : > { %1507 = vst [vmem:[%s2011_s26 + $0x260] sm:$0xff] %v1028_v17  ;;  %1066 = vmatmul.bf16.gmra.mxu1 %v553_v14  ;;  %1404 = vmatmul.bf16.gmra.mxu3 %v553_v14  ;;  %v494_v14 = vld [vmem:[%s2001_s22 + $0x3e0] sm:$0xff]  ;;  %v497_v17 = vld [vmem:[%s2001_s22 + $0x3f8] sm:$0xff] }
 0x22d   : > { %v1365_v19 = vpop.f32.mrf.mxu3 }
 0x22e   : > { %v1366_v21 = vadd.f32 %v1365_v19, %v1196_v18  ;;  %v560_v19 = vpack.c.bf16 %v496_v15, %v494_v14 }
 0x22f   : > { %v1029_v22 = vpop.f32.mrf.mxu1 }
 0x230   : > { %v1030_v23 = vadd.f32 %v1029_v22, %v860_v20  ;;  %1508 = vst.msk [vmem:[%s2011_s26 + $0x268] sm:$0xff] %vm1431_vm3, %v1366_v21  ;;  %v1198_v28 = vpop.f32.mrf.mxu2  ;;  %v561_v22 = vpack.c.bf16 %v497_v17, %v495_v16 }
 0x231   : > { %v863_v31 = vpop.f32.mrf.mxu0 }
 0x232   : > { %1509 = vst [vmem:[%s2011_s26 + $0x270] sm:$0xff] %v1030_v23 }
 0x234   : > { %902 = vmatmul.bf16.gmra.mxu0 %v554_v29 }
 0x235   : > { %v1367_v30 = vpop.f32.mrf.mxu3  ;;  %1240 = vmatmul.bf16.gmra.mxu2 %v554_v29 }
 0x236   : > { %v1368_v33 = vadd.f32 %v1367_v30, %v1198_v28 }
 0x237   : > { %v1032_v34 = vpop.f32.mrf.mxu1 }
 0x238   : > { %v1033_v35 = vadd.f32 %v1032_v34, %v863_v31  ;;  %1510 = vst.msk [vmem:[%s2011_s26 + $0x278] sm:$0xff] %vm1431_vm3, %v1368_v33  ;;  %v1201_v36 = vpop.f32.mrf.mxu2 }
 0x239   : > { %v865_v38 = vpop.f32.mrf.mxu0 }
 0x23a   : > { %1511 = vst [vmem:[%s2011_s26 + $0x280] sm:$0xff] %v1033_v35  ;;  %1071 = vmatmul.bf16.gmra.mxu1 %v555_v32  ;;  %1409 = vmatmul.bf16.gmra.mxu3 %v555_v32 }
 0x23d   : > { %v1370_v37 = vpop.f32.mrf.mxu3 }
 0x23e   : > { %v1371_v39 = vadd.f32 %v1370_v37, %v1201_v36 }
 0x23f   : > { %v1034_v40 = vpop.f32.mrf.mxu1 }
 0x240   : > { %v1035_v41 = vadd.f32 %v1034_v40, %v865_v38  ;;  %1512 = vst.msk [vmem:[%s2011_s26 + $0x288] sm:$0xff] %vm1431_vm3, %v1371_v39  ;;  %v1203_v46 = vpop.f32.mrf.mxu2 }
 0x241   : > { %v868_v49 = vpop.f32.mrf.mxu0 }
 0x242   : > { %1513 = vst [vmem:[%s2011_s26 + $0x290] sm:$0xff] %v1035_v41 }
 0x244   : > { %907 = vmatmul.bf16.gmra.mxu0 %v556_v47 }
 0x245   : > { %v1372_v48 = vpop.f32.mrf.mxu3  ;;  %1245 = vmatmul.bf16.gmra.mxu2 %v556_v47 }
 0x246   : > { %v1373_v5 = vadd.f32 %v1372_v48, %v1203_v46 }
 0x247   : > { %v1037_v51 = vpop.f32.mrf.mxu1 }
 0x248   : > { %v1038_v52 = vadd.f32 %v1037_v51, %v868_v49  ;;  %1514 = vst.msk [vmem:[%s2011_s26 + $0x298] sm:$0xff] %vm1431_vm3, %v1373_v5  ;;  %v1206_v53 = vpop.f32.mrf.mxu2 }
 0x249   : > { %v870_v55 = vpop.f32.mrf.mxu0 }
 0x24a   : > { %1515 = vst [vmem:[%s2011_s26 + $0x2a0] sm:$0xff] %v1038_v52  ;;  %1076 = vmatmul.bf16.gmra.mxu1 %v557_v50  ;;  %1414 = vmatmul.bf16.gmra.mxu3 %v557_v50 }
 0x24d   : > { %v1375_v54 = vpop.f32.mrf.mxu3 }
 0x24e   : > { %v1376_v56 = vadd.f32 %v1375_v54, %v1206_v53 }
 0x24f   : > { %v1039_v57 = vpop.f32.mrf.mxu1 }
 0x250   : > { %v1040_v58 = vadd.f32 %v1039_v57, %v870_v55  ;;  %1516 = vst.msk [vmem:[%s2011_s26 + $0x2a8] sm:$0xff] %vm1431_vm3, %v1376_v56  ;;  %v1208_v63 = vpop.f32.mrf.mxu2 }
 0x251   : > { %v873_v2 = vpop.f32.mrf.mxu0 }
 0x252   : > { %1517 = vst [vmem:[%s2011_s26 + $0x2b0] sm:$0xff] %v1040_v58 }
 0x254   : > { %912 = vmatmul.bf16.gmra.mxu0 %v558_v0 }
 0x255   : > { %v1377_v1 = vpop.f32.mrf.mxu3  ;;  %1250 = vmatmul.bf16.gmra.mxu2 %v558_v0 }
 0x256   : > { %v1378_v4 = vadd.f32 %v1377_v1, %v1208_v63 }
 0x257   : > { %v1042_v6 = vpop.f32.mrf.mxu1 }
 0x258   : > { %v1043_v7 = vadd.f32 %v1042_v6, %v873_v2  ;;  %1518 = vst.msk [vmem:[%s2011_s26 + $0x2b8] sm:$0xff] %vm1431_vm3, %v1378_v4  ;;  %v1211_v8 = vpop.f32.mrf.mxu2 }
 0x259   : > { %v875_v10 = vpop.f32.mrf.mxu0 }
 0x25a   : > { %1519 = vst [vmem:[%s2011_s26 + $0x2c0] sm:$0xff] %v1043_v7  ;;  %1081 = vmatmul.bf16.gmra.mxu1 %v559_v3  ;;  %1419 = vmatmul.bf16.gmra.mxu3 %v559_v3 }
 0x25d   : > { %v1380_v9 = vpop.f32.mrf.mxu3 }
 0x25e   : > { %v1381_v11 = vadd.f32 %v1380_v9, %v1211_v8 }
 0x25f   : > { %v1044_v12 = vpop.f32.mrf.mxu1 }
 0x260   : > { %v1045_v13 = vadd.f32 %v1044_v12, %v875_v10  ;;  %1520 = vst.msk [vmem:[%s2011_s26 + $0x2c8] sm:$0xff] %vm1431_vm3, %v1381_v11  ;;  %v1213_v18 = vpop.f32.mrf.mxu2 }
 0x261   : > { %v878_v21 = vpop.f32.mrf.mxu0 }
 0x262   : > { %1521 = vst [vmem:[%s2011_s26 + $0x2d0] sm:$0xff] %v1045_v13 }
 0x264   : > { %917 = vmatmul.bf16.gmra.mxu0 %v560_v19 }
 0x265   : > { %v1382_v20 = vpop.f32.mrf.mxu3  ;;  %1255 = vmatmul.bf16.gmra.mxu2 %v560_v19 }
 0x266   : > { %v1383_v23 = vadd.f32 %v1382_v20, %v1213_v18 }
 0x267   : > { %v1047_v24 = vpop.f32.mrf.mxu1 }
 0x268   : > { %v1048_v25 = vadd.f32 %v1047_v24, %v878_v21  ;;  %1522 = vst.msk [vmem:[%s2011_s26 + $0x2d8] sm:$0xff] %vm1431_vm3, %v1383_v23  ;;  %v1216_v26 = vpop.f32.mrf.mxu2 }
 0x269   : > { %v880_v28 = vpop.f32.mrf.mxu0 }
 0x26a   : > { %1523 = vst [vmem:[%s2011_s26 + $0x2e0] sm:$0xff] %v1048_v25  ;;  %1086 = vmatmul.bf16.gmra.mxu1 %v561_v22  ;;  %1424 = vmatmul.bf16.gmra.mxu3 %v561_v22 }
 0x26d   : > { %v1385_v27 = vpop.f32.mrf.mxu3 }
 0x26e   : > { %v1386_v29 = vadd.f32 %v1385_v27, %v1216_v26 }
 0x26f   : > { %v1049_v30 = vpop.f32.mrf.mxu1 }
 0x270   : > { %v1050_v31 = vadd.f32 %v1049_v30, %v880_v28  ;;  %1524 = vst.msk [vmem:[%s2011_s26 + $0x2e8] sm:$0xff] %vm1431_vm3, %v1386_v29  ;;  %v1218_v32 = vpop.f32.mrf.mxu2 }
 0x271   : > { %v883_v34 = vpop.f32.mrf.mxu0 }
 0x272   : > { %1525 = vst [vmem:[%s2011_s26 + $0x2f0] sm:$0xff] %v1050_v31 }
 0x275   : > { %v1387_v33 = vpop.f32.mrf.mxu3 }
 0x276   : > { %v1388_v35 = vadd.f32 %v1387_v33, %v1218_v32 }
 0x277   : > { %v1052_v36 = vpop.f32.mrf.mxu1 }
 0x278   : > { %v1053_v37 = vadd.f32 %v1052_v36, %v883_v34  ;;  %1526 = vst.msk [vmem:[%s2011_s26 + $0x2f8] sm:$0xff] %vm1431_vm3, %v1388_v35  ;;  %v1221_v38 = vpop.f32.mrf.mxu2 }
 0x279   : > { %v885_v40 = vpop.f32.mrf.mxu0 }
 0x27a   : > { %1527 = vst [vmem:[%s2011_s26 + $0x300] sm:$0xff] %v1053_v37 }
 0x27d   : > { %v1390_v39 = vpop.f32.mrf.mxu3 }
 0x27e   : > { %v1391_v41 = vadd.f32 %v1390_v39, %v1221_v38 }
 0x27f   : > { %v1054_v42 = vpop.f32.mrf.mxu1 }
 0x280   : > { %v1055_v43 = vadd.f32 %v1054_v42, %v885_v40  ;;  %1528 = vst.msk [vmem:[%s2011_s26 + $0x308] sm:$0xff] %vm1431_vm3, %v1391_v41  ;;  %v1223_v44 = vpop.f32.mrf.mxu2 }
 0x281   : > { %v888_v46 = vpop.f32.mrf.mxu0 }
 0x282   : > { %1529 = vst [vmem:[%s2011_s26 + $0x310] sm:$0xff] %v1055_v43 }
 0x285   : > { %v1392_v45 = vpop.f32.mrf.mxu3 }
 0x286   : > { %v1393_v47 = vadd.f32 %v1392_v45, %v1223_v44 }
 0x287   : > { %v1057_v48 = vpop.f32.mrf.mxu1 }
 0x288   : > { %v1058_v49 = vadd.f32 %v1057_v48, %v888_v46  ;;  %1530 = vst.msk [vmem:[%s2011_s26 + $0x318] sm:$0xff] %vm1431_vm3, %v1393_v47  ;;  %v1226_v50 = vpop.f32.mrf.mxu2 }
 0x289   : > { %v890_v51 = vpop.f32.mrf.mxu0 }
 0x28a   : > { %1531 = vst [vmem:[%s2011_s26 + $0x320] sm:$0xff] %v1058_v49 }
 0x28d   : > { %v1395_v5 = vpop.f32.mrf.mxu3 }
 0x28e   : > { %v1396_v52 = vadd.f32 %v1395_v5, %v1226_v50 }
 0x28f   : > { %v1059_v53 = vpop.f32.mrf.mxu1 }
 0x290   : > { %v1060_v54 = vadd.f32 %v1059_v53, %v890_v51  ;;  %1532 = vst.msk [vmem:[%s2011_s26 + $0x328] sm:$0xff] %vm1431_vm3, %v1396_v52  ;;  %v1228_v55 = vpop.f32.mrf.mxu2 }
 0x291   : > { %v893_v57 = vpop.f32.mrf.mxu0 }
 0x292   : > { %1533 = vst [vmem:[%s2011_s26 + $0x330] sm:$0xff] %v1060_v54 }
 0x295   : > { %v1397_v56 = vpop.f32.mrf.mxu3 }
 0x296   : > { %v1398_v58 = vadd.f32 %v1397_v56, %v1228_v55 }
 0x297   : > { %v1062_v59 = vpop.f32.mrf.mxu1 }
 0x298   : > { %v1063_v60 = vadd.f32 %v1062_v59, %v893_v57  ;;  %1534 = vst.msk [vmem:[%s2011_s26 + $0x338] sm:$0xff] %vm1431_vm3, %v1398_v58  ;;  %v1231_v61 = vpop.f32.mrf.mxu2 }
 0x299   : > { %v895_v63 = vpop.f32.mrf.mxu0 }
 0x29a   : > { %1535 = vst [vmem:[%s2011_s26 + $0x340] sm:$0xff] %v1063_v60 }
 0x29d   : > { %v1400_v62 = vpop.f32.mrf.mxu3 }
 0x29e   : > { %v1401_v0 = vadd.f32 %v1400_v62, %v1231_v61 }
 0x29f   : > { %v1064_v1 = vpop.f32.mrf.mxu1 }
 0x2a0   : > { %v1065_v2 = vadd.f32 %v1064_v1, %v895_v63  ;;  %1536 = vst.msk [vmem:[%s2011_s26 + $0x348] sm:$0xff] %vm1431_vm3, %v1401_v0  ;;  %v1233_v3 = vpop.f32.mrf.mxu2 }
 0x2a1   : > { %v898_v6 = vpop.f32.mrf.mxu0 }
 0x2a2   : > { %1537 = vst [vmem:[%s2011_s26 + $0x350] sm:$0xff] %v1065_v2 }
 0x2a5   : > { %v1402_v4 = vpop.f32.mrf.mxu3 }
 0x2a6   : > { %v1403_v7 = vadd.f32 %v1402_v4, %v1233_v3 }
 0x2a7   : > { %v1067_v8 = vpop.f32.mrf.mxu1 }
 0x2a8   : > { %v1068_v9 = vadd.f32 %v1067_v8, %v898_v6  ;;  %1538 = vst.msk [vmem:[%s2011_s26 + $0x358] sm:$0xff] %vm1431_vm3, %v1403_v7  ;;  %v1236_v10 = vpop.f32.mrf.mxu2 }
 0x2a9   : > { %v900_v12 = vpop.f32.mrf.mxu0 }
 0x2aa   : > { %1539 = vst [vmem:[%s2011_s26 + $0x360] sm:$0xff] %v1068_v9 }
 0x2ad   : > { %v1405_v11 = vpop.f32.mrf.mxu3 }
 0x2ae   : > { %v1406_v13 = vadd.f32 %v1405_v11, %v1236_v10 }
 0x2af   : > { %v1069_v14 = vpop.f32.mrf.mxu1 }
 0x2b0   : > { %v1070_v15 = vadd.f32 %v1069_v14, %v900_v12  ;;  %1540 = vst.msk [vmem:[%s2011_s26 + $0x368] sm:$0xff] %vm1431_vm3, %v1406_v13  ;;  %v1238_v16 = vpop.f32.mrf.mxu2 }
 0x2b1   : > { %v903_v18 = vpop.f32.mrf.mxu0 }
 0x2b2   : > { %1541 = vst [vmem:[%s2011_s26 + $0x370] sm:$0xff] %v1070_v15 }
 0x2b5   : > { %v1407_v17 = vpop.f32.mrf.mxu3 }
 0x2b6   : > { %v1408_v19 = vadd.f32 %v1407_v17, %v1238_v16 }
 0x2b7   : > { %v1072_v20 = vpop.f32.mrf.mxu1 }
 0x2b8   : > { %v1073_v21 = vadd.f32 %v1072_v20, %v903_v18  ;;  %1542 = vst.msk [vmem:[%s2011_s26 + $0x378] sm:$0xff] %vm1431_vm3, %v1408_v19  ;;  %v1241_v22 = vpop.f32.mrf.mxu2 }
 0x2b9   : > { %v905_v24 = vpop.f32.mrf.mxu0 }
 0x2ba   : > { %1543 = vst [vmem:[%s2011_s26 + $0x380] sm:$0xff] %v1073_v21 }
 0x2bd   : > { %v1410_v23 = vpop.f32.mrf.mxu3 }
 0x2be   : > { %v1411_v25 = vadd.f32 %v1410_v23, %v1241_v22 }
 0x2bf   : > { %v1074_v26 = vpop.f32.mrf.mxu1 }
 0x2c0   : > { %v1075_v27 = vadd.f32 %v1074_v26, %v905_v24  ;;  %1544 = vst.msk [vmem:[%s2011_s26 + $0x388] sm:$0xff] %vm1431_vm3, %v1411_v25  ;;  %v1243_v28 = vpop.f32.mrf.mxu2 }
 0x2c1   : > { %v908_v30 = vpop.f32.mrf.mxu0 }
 0x2c2   : > { %1545 = vst [vmem:[%s2011_s26 + $0x390] sm:$0xff] %v1075_v27 }
 0x2c5   : > { %v1412_v29 = vpop.f32.mrf.mxu3 }
 0x2c6   : > { %v1413_v31 = vadd.f32 %v1412_v29, %v1243_v28 }
 0x2c7   : > { %v1077_v32 = vpop.f32.mrf.mxu1 }
 0x2c8   : > { %v1078_v33 = vadd.f32 %v1077_v32, %v908_v30  ;;  %1546 = vst.msk [vmem:[%s2011_s26 + $0x398] sm:$0xff] %vm1431_vm3, %v1413_v31  ;;  %v1246_v34 = vpop.f32.mrf.mxu2 }
 0x2c9   : > { %v910_v36 = vpop.f32.mrf.mxu0 }
 0x2ca   : > { %1547 = vst [vmem:[%s2011_s26 + $0x3a0] sm:$0xff] %v1078_v33 }
 0x2cd   : > { %v1415_v35 = vpop.f32.mrf.mxu3 }
 0x2ce   : > { %v1416_v37 = vadd.f32 %v1415_v35, %v1246_v34 }
 0x2cf   : > { %v1079_v38 = vpop.f32.mrf.mxu1 }
 0x2d0   : > { %v1080_v39 = vadd.f32 %v1079_v38, %v910_v36  ;;  %1548 = vst.msk [vmem:[%s2011_s26 + $0x3a8] sm:$0xff] %vm1431_vm3, %v1416_v37  ;;  %v1248_v40 = vpop.f32.mrf.mxu2 }
 0x2d1   : > { %v913_v42 = vpop.f32.mrf.mxu0 }
 0x2d2   : > { %1549 = vst [vmem:[%s2011_s26 + $0x3b0] sm:$0xff] %v1080_v39 }
 0x2d5   : > { %v1417_v41 = vpop.f32.mrf.mxu3 }
 0x2d6   : > { %v1418_v43 = vadd.f32 %v1417_v41, %v1248_v40 }
 0x2d7   : > { %v1082_v44 = vpop.f32.mrf.mxu1 }
 0x2d8   : > { %v1083_v45 = vadd.f32 %v1082_v44, %v913_v42  ;;  %1550 = vst.msk [vmem:[%s2011_s26 + $0x3b8] sm:$0xff] %vm1431_vm3, %v1418_v43  ;;  %v1251_v46 = vpop.f32.mrf.mxu2 }
 0x2d9   : > { %v915_v48 = vpop.f32.mrf.mxu0 }
 0x2da   : > { %1551 = vst [vmem:[%s2011_s26 + $0x3c0] sm:$0xff] %v1083_v45 }
 0x2dd   : > { %v1420_v47 = vpop.f32.mrf.mxu3 }
 0x2de   : > { %v1421_v49 = vadd.f32 %v1420_v47, %v1251_v46 }
 0x2df   : > { %v1084_v50 = vpop.f32.mrf.mxu1 }
 0x2e0   : > { %v1085_v5 = vadd.f32 %v1084_v50, %v915_v48  ;;  %1552 = vst.msk [vmem:[%s2011_s26 + $0x3c8] sm:$0xff] %vm1431_vm3, %v1421_v49  ;;  %v1253_v51 = vpop.f32.mrf.mxu2 }
 0x2e1   : > { %v918_v53 = vpop.f32.mrf.mxu0 }
 0x2e2   : > { %1553 = vst [vmem:[%s2011_s26 + $0x3d0] sm:$0xff] %v1085_v5 }
 0x2e5   : > { %v1422_v52 = vpop.f32.mrf.mxu3 }
 0x2e6   : > { %v1423_v54 = vadd.f32 %v1422_v52, %v1253_v51 }
 0x2e7   : > { %v1087_v55 = vpop.f32.mrf.mxu1 }
 0x2e8   : > { %v1088_v56 = vadd.f32 %v1087_v55, %v918_v53  ;;  %1554 = vst.msk [vmem:[%s2011_s26 + $0x3d8] sm:$0xff] %vm1431_vm3, %v1423_v54  ;;  %v1256_v57 = vpop.f32.mrf.mxu2 }
 0x2e9   : > { %v920_v59 = vpop.f32.mrf.mxu0 }
 0x2ea   : > { %1555 = vst [vmem:[%s2011_s26 + $0x3e0] sm:$0xff] %v1088_v56 }
 0x2ed   : > { %v1425_v58 = vpop.f32.mrf.mxu3 }
 0x2ee   : > { %v1426_v60 = vadd.f32 %v1425_v58, %v1256_v57 }
 0x2ef   : > { %v1089_v61 = vpop.f32.mrf.mxu1 }
 0x2f0   : > { %v1090_v62 = vadd.f32 %v1089_v61, %v920_v59  ;;  %1556 = vst.msk [vmem:[%s2011_s26 + $0x3e8] sm:$0xff] %vm1431_vm3, %v1426_v60  ;;  %v1258_v63 = vpop.f32.mrf.mxu2 }
 0x2f2   : > { %1557 = vst [vmem:[%s2011_s26 + $0x3f0] sm:$0xff] %v1090_v62 }
 0x2f5   : > { %v1427_v0 = vpop.f32.mrf.mxu3 }
 0x2f6   : > { %v1428_v1 = vadd.f32 %v1427_v0, %v1258_v63 }
 0x2f8   : > { %1558 = vst.msk [vmem:[%s2011_s26 + $0x3f8] sm:$0xff] %vm1431_vm3, %v1428_v1 }
 0x2f9 PF: > { %p12_p7 = scmp.ge.s32.totalorder %s1953_s14, 4   ;;  %s2615_s9 = smov %s1904_s10 }
 0x2fa   : > { %s2616_s10 = smov %s1908_s11  ;;  %s2617_s11 = smov %s1963_s17 }
 0x2fb   : > { %s2618_s12 = smov %s1953_s14  ;;  %14 = sbr.rel (!%p12_p7) target bundleno = 3 (0x3), region = 72 }
 0x300   :  { %1583 = vsyncpa [#allocation4], 1 }
 0x301   :  { %1585 = vsyncpa [#allocation4 + $0x1], 1 }

</bundles_post_ra>
